<compile_context>
chip_gen: v5e
topology: v5e:2x2
jax: 0.10.0
libtpu: 0.0.40
codegen_flags: <defaults>
</compile_context>

<pallas_src>
import functools

import jax
import jax.numpy as jnp
from jax.experimental import pallas as pl
from jax.experimental.pallas import tpu as pltpu


def _silu(x):
    return x * jax.nn.sigmoid(x)


def _round_up(x, m):
    return (x + m - 1) // m * m


# ---------------------------------------------------------------------------
# Kernel
# ---------------------------------------------------------------------------
def conv_egnn_kernel(
    ped_ref, h_ref, hn_ref, rel_ref, mask_ref,
    w_node_ref, w_edge_ref, w_x2_ref, b_hid_ref, b_sm_ref,
    out_ref,
):
    k, tm, hdim = hn_ref.shape
    f32 = jnp.float32
    bf16 = jnp.bfloat16

    h = h_ref[...]                                   # [tm, H] f32 (exact residual)
    hb = h.astype(bf16)

    # ---- fused node-side matmul: h @ [we1s | wh1s | wa] --------------------
    node = jnp.dot(hb, w_node_ref[...], preferred_element_type=f32)  # [tm, 2H+2]
    e_self = node[:, 0:hdim]                         # f_e layer-1, h_st block
    h1_self = node[:, hdim:2 * hdim]                 # f_h layer-1, h_st block
    fa_pre = node[:, 2 * hdim:2 * hdim + 2]          # f_a pre-activation

    # ---- packed weight / bias slabs (static, zero-cost row views) ----------
    we1n = w_edge_ref[0 * hdim:1 * hdim, :]
    we2 = w_edge_ref[1 * hdim:2 * hdim, :]
    wx1 = w_edge_ref[2 * hdim:3 * hdim, :]
    wh1m = w_edge_ref[3 * hdim:4 * hdim, :]
    wh2 = w_edge_ref[4 * hdim:5 * hdim, :]

    we1d = b_hid_ref[0:1, :]                         # f_e layer-1 dist column
    be1 = b_hid_ref[1:2, :]
    be2 = b_hid_ref[2:3, :]
    bx1 = b_hid_ref[3:4, :]
    bh1 = b_hid_ref[4:5, :]
    bh2 = b_hid_ref[5:6, :]
    bx2 = b_sm_ref[0:1, :]                           # [1, 2]
    ba = b_sm_ref[1:2, :]                            # [1, 2]

    # ---- per-edge tensors (k-major: leading-axis ops are cheap) ------------
    hn = hn_ref[...]                                 # [k, tm, H]  bf16
    rel = rel_ref[...]                               # [k, tm, 2]  f32
    mask = mask_ref[...]                             # [k, tm, 1]  f32

    # ---- f_e ----------------------------------------------------------------
    dist = jnp.sqrt(jnp.sum(rel * rel, axis=-1, keepdims=True))       # [k, tm, 1]
    e_neigh = jnp.dot(hn.reshape(k * tm, hdim), we1n,
                      preferred_element_type=f32).reshape(k, tm, hdim)
    e1 = _silu(e_neigh + e_self[None] + dist * we1d[None] + be1[None])
    m_ij = _silu(
        jnp.dot(e1.reshape(k * tm, hdim).astype(bf16), we2,
                preferred_element_type=f32) + be2)                    # [k*tm, H]

    # ---- f_x ----------------------------------------------------------------
    x1 = _silu(jnp.dot(m_ij.astype(bf16), wx1,
                       preferred_element_type=f32) + bx1)
    fx = _silu(jnp.dot(x1.astype(bf16), w_x2_ref[...],
                       preferred_element_type=f32) + bx2)             # [k*tm, 2]
    fx = fx.reshape(k, tm, 2)

    # masked aggregation over neighbours: leading-axis sum == k VPU adds
    agg = jnp.sum(rel * fx * mask, axis=0)                            # [tm, 2]
    neigh_num = jnp.sum(mask, axis=0)                                 # [tm, 1]
    agg = agg / (neigh_num + 1e-6)

    # ---- f_a + kinematics ---------------------------------------------------
    ped = ped_ref[...]                                                # [tm, 6]
    fa = _silu(fa_pre + ba)
    a_new = fa * ped[:, 4:6] + agg
    v_new = ped[:, 2:4] + a_new
    x_new = ped[:, 0:2] + v_new

    # ---- f_h (m_i deliberately includes masked neighbours, as in PyTorch) --
    m_i = jnp.sum(m_ij.reshape(k, tm, hdim), axis=0)                  # [tm, H]
    h1 = _silu(h1_self
               + jnp.dot(m_i.astype(bf16), wh1m, preferred_element_type=f32)
               + bh1)
    h2 = jnp.dot(h1.astype(bf16), wh2, preferred_element_type=f32) + bh2
    h_out = h + h2

    # single packed output slab: [h_out | x_new | v_new | a_new]
    out_ref[...] = jnp.concatenate([h_out, x_new, v_new, a_new], axis=-1)


# ---------------------------------------------------------------------------
# Wrapper
# ---------------------------------------------------------------------------
def _pack_params(params):
    """Pack 17 Linear weights/biases into 5 slabs (bf16 matmul weights)."""
    bf16 = jnp.bfloat16
    f32 = jnp.float32
    w_node = jnp.concatenate(
        [params["we1s"], params["wh1s"], params["wa"]], axis=1).astype(bf16)
    w_edge = jnp.concatenate(
        [params["we1n"], params["we2"], params["wx1"],
         params["wh1m"], params["wh2"]], axis=0).astype(bf16)
    w_x2 = params["wx2"].astype(bf16)
    b_hid = jnp.concatenate(
        [params["we1d"], params["be1"], params["be2"],
         params["bx1"], params["bh1"], params["bh2"]], axis=0).astype(f32)
    b_sm = jnp.concatenate([params["bx2"], params["ba"]], axis=0).astype(f32)
    return w_node, w_edge, w_x2, b_hid, b_sm


def _compiler_params():
    kwargs = dict(dimension_semantics=("parallel",))
    try:
        cap = pltpu.get_tpu_info().vmem_capacity_bytes
        # Raise the default scoped-VMEM limit so large row tiles fit, but stay
        # comfortably inside the smallest per-core VMEM (64 MiB on v7x).
        kwargs["vmem_limit_bytes"] = min(48 * 1024 * 1024, int(cap * 3 // 4))
    except Exception:
        pass  # keep the backend's default scoped-VMEM limit
    return pltpu.CompilerParams(**kwargs)


@functools.partial(jax.jit, static_argnames=("tm",))
def conv_egnn_forward(params, ped_features, h_st, h_neigh, rela_features,
                      neigh_mask, *, tm=256):
    bs, n, k, hdim = h_neigh.shape
    assert hdim % 8 == 0, "hid_dim must be a multiple of 8"
    m = bs * n

    # Row tile: as large as requested, clamped to the (16-aligned) problem size;
    # rows are zero-padded so the grid divides evenly (padded rows are inert).
    tm = max(16, min(tm, _round_up(m, 16)))
    tm = _round_up(tm, 16)
    m_pad = _round_up(m, tm)
    pad = m_pad - m

    def pad_rows(x):
        return jnp.pad(x, ((0, pad),) + ((0, 0),) * (x.ndim - 1))

    f32 = jnp.float32
    ped = pad_rows(ped_features.reshape(m, 6).astype(f32))
    h = pad_rows(h_st.reshape(m, hdim).astype(f32))

    # Per-edge tensors: layout plumbing to k-major [k, rows, feat] (fused with
    # the bf16 cast for h_neigh, the dominant HBM tensor).
    hn = jnp.pad(
        jnp.transpose(h_neigh.reshape(m, k, hdim), (1, 0, 2)).astype(jnp.bfloat16),
        ((0, 0), (0, pad), (0, 0)))
    rel = jnp.pad(
        jnp.transpose(rela_features[..., :2].reshape(m, k, 2), (1, 0, 2)).astype(f32),
        ((0, 0), (0, pad), (0, 0)))
    mask = jnp.pad(
        jnp.transpose(neigh_mask.reshape(m, k), (1, 0)).astype(f32)[..., None],
        ((0, 0), (0, pad), (0, 0)))

    w_node, w_edge, w_x2, b_hid, b_sm = _pack_params(params)

    row2 = lambda i: (i, 0)
    edge3 = lambda i: (0, i, 0)
    const2 = lambda i: (0, 0)

    in_specs = [
        pl.BlockSpec((tm, 6), row2),           # ped_features
        pl.BlockSpec((tm, hdim), row2),        # h_st (f32, exact residual)
        pl.BlockSpec((k, tm, hdim), edge3),    # h_neigh (k-major, bf16)
        pl.BlockSpec((k, tm, 2), edge3),       # rela_xy (k-major)
        pl.BlockSpec((k, tm, 1), edge3),       # neigh_mask (k-major)
        pl.BlockSpec(w_node.shape, const2),    # [we1s | wh1s | wa]
        pl.BlockSpec(w_edge.shape, const2),    # [we1n; we2; wx1; wh1m; wh2]
        pl.BlockSpec(w_x2.shape, const2),      # wx2
        pl.BlockSpec(b_hid.shape, const2),     # [we1d; be1; be2; bx1; bh1; bh2]
        pl.BlockSpec(b_sm.shape, const2),      # [bx2; ba]
    ]
    out_specs = pl.BlockSpec((tm, hdim + 6), row2)
    out_shape = jax.ShapeDtypeStruct((m_pad, hdim + 6), f32)

    out = pl.pallas_call(
        conv_egnn_kernel,
        grid=(m_pad // tm,),
        in_specs=in_specs,
        out_specs=out_specs,
        out_shape=out_shape,
        compiler_params=_compiler_params(),
    )(ped, h, hn, rel, mask, w_node, w_edge, w_x2, b_hid, b_sm)

    out = out[:m]
    h_out = out[:, :hdim].reshape(bs, n, hdim)
    feat = out[:, hdim:hdim + 6].reshape(bs, n, 6)
    return feat, h_out


# ---------------------------------------------------------------------------
# Parameters + pure-JAX reference (f32 mirror of the PyTorch forward)
# ---------------------------------------------------------------------------
def init_params(key, in_dim, hid_dim):
    keys = jax.random.split(key, 17)

    def w(kk, fi, fo):
        return jax.random.normal(kk, (fi, fo), jnp.float32) / jnp.sqrt(float(fi))

    def b(kk, fo):
        return 0.1 * jax.random.normal(kk, (1, fo), jnp.float32)

    p = {}
    p["we1s"] = w(keys[0], in_dim, hid_dim)    # f_e layer1, h_st block
    p["we1n"] = w(keys[1], in_dim, hid_dim)    # f_e layer1, h_neigh block
    p["we1d"] = w(keys[2], 1, hid_dim)         # f_e layer1, dist block
    p["be1"] = b(keys[3], hid_dim)
    p["we2"] = w(keys[4], hid_dim, hid_dim)    # f_e layer2
    p["be2"] = b(keys[5], hid_dim)
    p["wx1"] = w(keys[6], hid_dim, hid_dim)    # f_x layer1
    p["bx1"] = b(keys[7], hid_dim)
    p["wx2"] = w(keys[8], hid_dim, 2)          # f_x layer2
    p["bx2"] = b(keys[9], 2)
    p["wa"] = w(keys[10], hid_dim, 2)          # f_a
    p["ba"] = b(keys[11], 2)
    p["wh1s"] = w(keys[12], in_dim, hid_dim)   # f_h layer1, h_st block
    p["wh1m"] = w(keys[13], hid_dim, hid_dim)  # f_h layer1, m_i block
    p["bh1"] = b(keys[14], hid_dim)
    p["wh2"] = w(keys[15], hid_dim, hid_dim)   # f_h layer2
    p["bh2"] = b(keys[16], hid_dim)
    return p


def conv_egnn_reference(params, ped_features, h_st, h_neigh, rela_features, neigh_mask):
    dists = jnp.linalg.norm(rela_features[..., :2], axis=-1)
    neigh_num = neigh_mask.sum(-1)
    h_rep = jnp.broadcast_to(h_st[..., None, :], h_neigh.shape)
    tmp = jnp.concatenate([h_rep, h_neigh, dists[..., None]], -1)
    we1 = jnp.concatenate([params["we1s"], params["we1n"], params["we1d"]], 0)
    e1 = _silu(tmp @ we1 + params["be1"])
    m_ij = _silu(e1 @ params["we2"] + params["be2"])
    fx = _silu(_silu(m_ij @ params["wx1"] + params["bx1"]) @ params["wx2"] + params["bx2"])
    agg = rela_features[..., :2] * fx
    agg = agg * neigh_mask[..., None]
    agg = 1.0 / (neigh_num[..., None] + 1e-6) * agg.sum(-2)
    fa = _silu(h_st @ params["wa"] + params["ba"])
    a_new = fa * ped_features[..., 4:] + agg
    v_new = ped_features[..., 2:4] + a_new
    x_new = ped_features[..., :2] + v_new
    m_i = m_ij.sum(-2)
    wh1 = jnp.concatenate([params["wh1s"], params["wh1m"]], 0)
    h1 = _silu(jnp.concatenate([h_st, m_i], -1) @ wh1 + params["bh1"])
    h_new = h_st + (h1 @ params["wh2"] + params["bh2"])
    return jnp.concatenate([x_new, v_new, a_new], -1), h_new


if __name__ == "__main__":
    in_dim = hid_dim = 32          # residual h_st + f_h(...) requires in_dim == hid_dim
    bs, n, k = 2, 8, 4

    key = jax.random.PRNGKey(0)
    kp, k1, k2, k3, k4, k5 = jax.random.split(key, 6)
    params = init_params(kp, in_dim, hid_dim)

    ped_features = jax.random.normal(k1, (bs, n, 6), jnp.float32)
    h_st = jax.random.normal(k2, (bs, n, hid_dim), jnp.float32)
    h_neigh = jax.random.normal(k3, (bs, n, k, hid_dim), jnp.float32)
    rela_features = jax.random.normal(k4, (bs, n, k, 6), jnp.float32)
    neigh_mask = (jax.random.uniform(k5, (bs, n, k)) > 0.3).astype(jnp.float32)

    out_feat, h_out = jax.block_until_ready(
        conv_egnn_forward(params, ped_features, h_st, h_neigh, rela_features, neigh_mask)
    )

    ref_feat, ref_h = conv_egnn_reference(
        params, ped_features, h_st, h_neigh, rela_features, neigh_mask)

    assert out_feat.shape == (bs, n, 6) and h_out.shape == (bs, n, hid_dim)
    # Tolerances account for bf16 matmul operands (f32 accumulation / f32 SiLU).
    assert jnp.allclose(out_feat, ref_feat, atol=1e-1, rtol=5e-2)
    assert jnp.allclose(h_out, ref_h, atol=1e-1, rtol=5e-2)
    print("KERNEL_OK")
</pallas_src>

<mosaic_0001>
module attributes {stable_mosaic.version = 11 : i64} {
  func.func @conv_egnn_kernel(%arg0: i32, %arg1: memref<16x6xf32, #tpu.memory_space<vmem>>, %arg2: memref<16x32xf32, #tpu.memory_space<vmem>>, %arg3: memref<4x16x32xbf16, #tpu.memory_space<vmem>>, %arg4: memref<4x16x2xf32, #tpu.memory_space<vmem>>, %arg5: memref<4x16x1xf32, #tpu.memory_space<vmem>>, %arg6: memref<32x66xbf16, #tpu.memory_space<vmem>>, %arg7: memref<160x32xbf16, #tpu.memory_space<vmem>>, %arg8: memref<32x2xbf16, #tpu.memory_space<vmem>>, %arg9: memref<6x32xf32, #tpu.memory_space<vmem>>, %arg10: memref<2x2xf32, #tpu.memory_space<vmem>>, %arg11: memref<16x38xf32, #tpu.memory_space<vmem>>) attributes {dimension_semantics = [#tpu.dimension_semantics<parallel>], iteration_bounds = array<i64: 1>, scalar_prefetch = 0 : i64, scratch_operands = 0 : i64, tpu.core_type = #tpu.core_type<tc>, window_params = [{transform_indices = @transform_0, window_bounds = array<i64: 16, 6>}, {transform_indices = @transform_1, window_bounds = array<i64: 16, 32>}, {transform_indices = @transform_2, window_bounds = array<i64: 4, 16, 32>}, {transform_indices = @transform_3, window_bounds = array<i64: 4, 16, 2>}, {transform_indices = @transform_4, window_bounds = array<i64: 4, 16, 1>}, {pipeline_mode = #tpu.pipeline_mode<synchronous>, transform_indices = @transform_5, window_bounds = array<i64: 32, 66>}, {pipeline_mode = #tpu.pipeline_mode<synchronous>, transform_indices = @transform_6, window_bounds = array<i64: 160, 32>}, {pipeline_mode = #tpu.pipeline_mode<synchronous>, transform_indices = @transform_7, window_bounds = array<i64: 32, 2>}, {pipeline_mode = #tpu.pipeline_mode<synchronous>, transform_indices = @transform_8, window_bounds = array<i64: 6, 32>}, {pipeline_mode = #tpu.pipeline_mode<synchronous>, transform_indices = @transform_9, window_bounds = array<i64: 2, 2>}, {transform_indices = @transform_10, window_bounds = array<i64: 16, 38>}]} {
    %c0 = arith.constant 0 : index
    %c0_0 = arith.constant 0 : index
    %0 = vector.load %arg2[%c0, %c0_0] : memref<16x32xf32, #tpu.memory_space<vmem>>, vector<16x32xf32>
    %1 = arith.truncf %0 : vector<16x32xf32> to vector<16x32xbf16>
    %c0_1 = arith.constant 0 : index
    %c0_2 = arith.constant 0 : index
    %2 = vector.load %arg6[%c0_1, %c0_2] : memref<32x66xbf16, #tpu.memory_space<vmem>>, vector<32x66xbf16>
    %cst = arith.constant dense<0.000000e+00> : vector<16x66xf32>
    %3 = tpu.matmul %1, %2, %cst {dimension_numbers = #tpu.dot_dimension_numbers<[1], [0], [0], [1], [0, 0, 1, 1], [], []>} : vector<16x32xbf16>, vector<32x66xbf16>, vector<16x66xf32> -> vector<16x66xf32>
    %4 = vector.extract_strided_slice %3 {offsets = [0, 0], sizes = [16, 32], strides = [1, 1]} : vector<16x66xf32> to vector<16x32xf32>
    %5 = vector.extract_strided_slice %3 {offsets = [0, 32], sizes = [16, 32], strides = [1, 1]} : vector<16x66xf32> to vector<16x32xf32>
    %6 = vector.extract_strided_slice %3 {offsets = [0, 64], sizes = [16, 2], strides = [1, 1]} : vector<16x66xf32> to vector<16x2xf32>
    %c0_3 = arith.constant 0 : index
    %c0_4 = arith.constant 0 : index
    %7 = vector.load %arg7[%c0_3, %c0_4] : memref<160x32xbf16, #tpu.memory_space<vmem>>, vector<32x32xbf16>
    %c32 = arith.constant 32 : index
    %c0_5 = arith.constant 0 : index
    %8 = vector.load %arg7[%c32, %c0_5] : memref<160x32xbf16, #tpu.memory_space<vmem>>, vector<32x32xbf16>
    %c64 = arith.constant 64 : index
    %c0_6 = arith.constant 0 : index
    %9 = vector.load %arg7[%c64, %c0_6] : memref<160x32xbf16, #tpu.memory_space<vmem>>, vector<32x32xbf16>
    %c96 = arith.constant 96 : index
    %c0_7 = arith.constant 0 : index
    %10 = vector.load %arg7[%c96, %c0_7] : memref<160x32xbf16, #tpu.memory_space<vmem>>, vector<32x32xbf16>
    %c128 = arith.constant 128 : index
    %c0_8 = arith.constant 0 : index
    %11 = vector.load %arg7[%c128, %c0_8] : memref<160x32xbf16, #tpu.memory_space<vmem>>, vector<32x32xbf16>
    %c0_9 = arith.constant 0 : index
    %c0_10 = arith.constant 0 : index
    %12 = vector.load %arg9[%c0_9, %c0_10] : memref<6x32xf32, #tpu.memory_space<vmem>>, vector<1x32xf32>
    %c1 = arith.constant 1 : index
    %c0_11 = arith.constant 0 : index
    %13 = vector.load %arg9[%c1, %c0_11] : memref<6x32xf32, #tpu.memory_space<vmem>>, vector<1x32xf32>
    %c2 = arith.constant 2 : index
    %c0_12 = arith.constant 0 : index
    %14 = vector.load %arg9[%c2, %c0_12] : memref<6x32xf32, #tpu.memory_space<vmem>>, vector<1x32xf32>
    %c3 = arith.constant 3 : index
    %c0_13 = arith.constant 0 : index
    %15 = vector.load %arg9[%c3, %c0_13] : memref<6x32xf32, #tpu.memory_space<vmem>>, vector<1x32xf32>
    %c4 = arith.constant 4 : index
    %c0_14 = arith.constant 0 : index
    %16 = vector.load %arg9[%c4, %c0_14] : memref<6x32xf32, #tpu.memory_space<vmem>>, vector<1x32xf32>
    %c5 = arith.constant 5 : index
    %c0_15 = arith.constant 0 : index
    %17 = vector.load %arg9[%c5, %c0_15] : memref<6x32xf32, #tpu.memory_space<vmem>>, vector<1x32xf32>
    %c0_16 = arith.constant 0 : index
    %c0_17 = arith.constant 0 : index
    %18 = vector.load %arg10[%c0_16, %c0_17] : memref<2x2xf32, #tpu.memory_space<vmem>>, vector<1x2xf32>
    %c1_18 = arith.constant 1 : index
    %c0_19 = arith.constant 0 : index
    %19 = vector.load %arg10[%c1_18, %c0_19] : memref<2x2xf32, #tpu.memory_space<vmem>>, vector<1x2xf32>
    %c0_20 = arith.constant 0 : index
    %c0_21 = arith.constant 0 : index
    %c0_22 = arith.constant 0 : index
    %20 = vector.load %arg3[%c0_20, %c0_21, %c0_22] : memref<4x16x32xbf16, #tpu.memory_space<vmem>>, vector<4x16x32xbf16>
    %c0_23 = arith.constant 0 : index
    %c0_24 = arith.constant 0 : index
    %c0_25 = arith.constant 0 : index
    %21 = vector.load %arg4[%c0_23, %c0_24, %c0_25] : memref<4x16x2xf32, #tpu.memory_space<vmem>>, vector<4x16x2xf32>
    %c0_26 = arith.constant 0 : index
    %c0_27 = arith.constant 0 : index
    %c0_28 = arith.constant 0 : index
    %22 = vector.load %arg5[%c0_26, %c0_27, %c0_28] : memref<4x16x1xf32, #tpu.memory_space<vmem>>, vector<4x16x1xf32>
    %23 = arith.mulf %21, %21 : vector<4x16x2xf32>
    %cst_29 = arith.constant dense<0.000000e+00> : vector<4x16xf32>
    %24 = vector.multi_reduction <add>, %23, %cst_29 [2] : vector<4x16x2xf32> to vector<4x16xf32>
    %25 = vector.shape_cast %24 : vector<4x16xf32> to vector<4x16x1xf32>
    %26 = math.sqrt %25 : vector<4x16x1xf32>
    %27 = vector.shape_cast %20 : vector<4x16x32xbf16> to vector<64x32xbf16>
    %cst_30 = arith.constant dense<0.000000e+00> : vector<64x32xf32>
    %28 = tpu.matmul %27, %7, %cst_30 {dimension_numbers = #tpu.dot_dimension_numbers<[1], [0], [0], [1], [0, 0, 1, 1], [], []>} : vector<64x32xbf16>, vector<32x32xbf16>, vector<64x32xf32> -> vector<64x32xf32>
    %29 = vector.shape_cast %28 : vector<64x32xf32> to vector<4x16x32xf32>
    %30 = vector.shape_cast %4 : vector<16x32xf32> to vector<1x16x32xf32>
    %31 = vector.broadcast %30 : vector<1x16x32xf32> to vector<4x16x32xf32>
    %32 = arith.addf %29, %31 : vector<4x16x32xf32>
    %33 = vector.shape_cast %12 : vector<1x32xf32> to vector<1x1x32xf32>
    %34 = vector.broadcast %26 : vector<4x16x1xf32> to vector<4x16x32xf32>
    %35 = vector.broadcast %33 : vector<1x1x32xf32> to vector<4x16x32xf32>
    %36 = arith.mulf %34, %35 : vector<4x16x32xf32>
    %37 = arith.addf %32, %36 : vector<4x16x32xf32>
    %38 = vector.shape_cast %13 : vector<1x32xf32> to vector<1x1x32xf32>
    %39 = vector.broadcast %38 : vector<1x1x32xf32> to vector<4x16x32xf32>
    %40 = arith.addf %37, %39 : vector<4x16x32xf32>
    %41 = arith.negf %40 : vector<4x16x32xf32>
    %42 = math.exp %41 : vector<4x16x32xf32>
    %cst_31 = arith.constant 1.000000e+00 : f32
    %43 = vector.broadcast %cst_31 : f32 to vector<4x16x32xf32>
    %44 = arith.addf %43, %42 : vector<4x16x32xf32>
    %45 = arith.divf %43, %44 : vector<4x16x32xf32>
    %46 = arith.mulf %40, %45 : vector<4x16x32xf32>
    %47 = vector.shape_cast %46 : vector<4x16x32xf32> to vector<64x32xf32>
    %48 = arith.truncf %47 : vector<64x32xf32> to vector<64x32xbf16>
    %cst_32 = arith.constant dense<0.000000e+00> : vector<64x32xf32>
    %49 = tpu.matmul %48, %8, %cst_32 {dimension_numbers = #tpu.dot_dimension_numbers<[1], [0], [0], [1], [0, 0, 1, 1], [], []>} : vector<64x32xbf16>, vector<32x32xbf16>, vector<64x32xf32> -> vector<64x32xf32>
    %50 = vector.broadcast %14 : vector<1x32xf32> to vector<64x32xf32>
    %51 = arith.addf %49, %50 : vector<64x32xf32>
    %52 = arith.negf %51 : vector<64x32xf32>
    %53 = math.exp %52 : vector<64x32xf32>
    %cst_33 = arith.constant 1.000000e+00 : f32
    %54 = vector.broadcast %cst_33 : f32 to vector<64x32xf32>
    %55 = arith.addf %54, %53 : vector<64x32xf32>
    %56 = arith.divf %54, %55 : vector<64x32xf32>
    %57 = arith.mulf %51, %56 : vector<64x32xf32>
    %58 = arith.truncf %57 : vector<64x32xf32> to vector<64x32xbf16>
    %cst_34 = arith.constant dense<0.000000e+00> : vector<64x32xf32>
    %59 = tpu.matmul %58, %9, %cst_34 {dimension_numbers = #tpu.dot_dimension_numbers<[1], [0], [0], [1], [0, 0, 1, 1], [], []>} : vector<64x32xbf16>, vector<32x32xbf16>, vector<64x32xf32> -> vector<64x32xf32>
    %60 = vector.broadcast %15 : vector<1x32xf32> to vector<64x32xf32>
    %61 = arith.addf %59, %60 : vector<64x32xf32>
    %62 = arith.negf %61 : vector<64x32xf32>
    %63 = math.exp %62 : vector<64x32xf32>
    %cst_35 = arith.constant 1.000000e+00 : f32
    %64 = vector.broadcast %cst_35 : f32 to vector<64x32xf32>
    %65 = arith.addf %64, %63 : vector<64x32xf32>
    %66 = arith.divf %64, %65 : vector<64x32xf32>
    %67 = arith.mulf %61, %66 : vector<64x32xf32>
    %68 = arith.truncf %67 : vector<64x32xf32> to vector<64x32xbf16>
    %c0_36 = arith.constant 0 : index
    %c0_37 = arith.constant 0 : index
    %69 = vector.load %arg8[%c0_36, %c0_37] : memref<32x2xbf16, #tpu.memory_space<vmem>>, vector<32x2xbf16>
    %cst_38 = arith.constant dense<0.000000e+00> : vector<64x2xf32>
    %70 = tpu.matmul %68, %69, %cst_38 {dimension_numbers = #tpu.dot_dimension_numbers<[1], [0], [0], [1], [0, 0, 1, 1], [], []>} : vector<64x32xbf16>, vector<32x2xbf16>, vector<64x2xf32> -> vector<64x2xf32>
    %71 = vector.broadcast %18 : vector<1x2xf32> to vector<64x2xf32>
    %72 = arith.addf %70, %71 : vector<64x2xf32>
    %73 = arith.negf %72 : vector<64x2xf32>
    %74 = math.exp %73 : vector<64x2xf32>
    %cst_39 = arith.constant 1.000000e+00 : f32
    %75 = vector.broadcast %cst_39 : f32 to vector<64x2xf32>
    %76 = arith.addf %75, %74 : vector<64x2xf32>
    %77 = arith.divf %75, %76 : vector<64x2xf32>
    %78 = arith.mulf %72, %77 : vector<64x2xf32>
    %79 = vector.shape_cast %78 : vector<64x2xf32> to vector<4x16x2xf32>
    %80 = arith.mulf %21, %79 : vector<4x16x2xf32>
    %81 = vector.broadcast %22 : vector<4x16x1xf32> to vector<4x16x2xf32>
    %82 = arith.mulf %80, %81 : vector<4x16x2xf32>
    %cst_40 = arith.constant dense<0.000000e+00> : vector<16x2xf32>
    %83 = vector.multi_reduction <add>, %82, %cst_40 [0] : vector<4x16x2xf32> to vector<16x2xf32>
    %cst_41 = arith.constant dense<0.000000e+00> : vector<16x1xf32>
    %84 = vector.multi_reduction <add>, %22, %cst_41 [0] : vector<4x16x1xf32> to vector<16x1xf32>
    %cst_42 = arith.constant 9.99999997E-7 : f32
    %85 = vector.broadcast %cst_42 : f32 to vector<16x1xf32>
    %86 = arith.addf %84, %85 : vector<16x1xf32>
    %87 = vector.broadcast %86 : vector<16x1xf32> to vector<16x2xf32>
    %88 = arith.divf %83, %87 : vector<16x2xf32>
    %c0_43 = arith.constant 0 : index
    %c0_44 = arith.constant 0 : index
    %89 = vector.load %arg1[%c0_43, %c0_44] : memref<16x6xf32, #tpu.memory_space<vmem>>, vector<16x6xf32>
    %90 = vector.broadcast %19 : vector<1x2xf32> to vector<16x2xf32>
    %91 = arith.addf %6, %90 : vector<16x2xf32>
    %92 = arith.negf %91 : vector<16x2xf32>
    %93 = math.exp %92 : vector<16x2xf32>
    %cst_45 = arith.constant 1.000000e+00 : f32
    %94 = vector.broadcast %cst_45 : f32 to vector<16x2xf32>
    %95 = arith.addf %94, %93 : vector<16x2xf32>
    %96 = arith.divf %94, %95 : vector<16x2xf32>
    %97 = arith.mulf %91, %96 : vector<16x2xf32>
    %98 = vector.extract_strided_slice %89 {offsets = [0, 4], sizes = [16, 2], strides = [1, 1]} : vector<16x6xf32> to vector<16x2xf32>
    %99 = arith.mulf %97, %98 : vector<16x2xf32>
    %100 = arith.addf %99, %88 : vector<16x2xf32>
    %101 = vector.extract_strided_slice %89 {offsets = [0, 2], sizes = [16, 2], strides = [1, 1]} : vector<16x6xf32> to vector<16x2xf32>
    %102 = arith.addf %101, %100 : vector<16x2xf32>
    %103 = vector.extract_strided_slice %89 {offsets = [0, 0], sizes = [16, 2], strides = [1, 1]} : vector<16x6xf32> to vector<16x2xf32>
    %104 = arith.addf %103, %102 : vector<16x2xf32>
    %105 = vector.shape_cast %57 : vector<64x32xf32> to vector<4x16x32xf32>
    %cst_46 = arith.constant dense<0.000000e+00> : vector<16x32xf32>
    %106 = vector.multi_reduction <add>, %105, %cst_46 [0] : vector<4x16x32xf32> to vector<16x32xf32>
    %107 = arith.truncf %106 : vector<16x32xf32> to vector<16x32xbf16>
    %cst_47 = arith.constant dense<0.000000e+00> : vector<16x32xf32>
    %108 = tpu.matmul %107, %10, %cst_47 {dimension_numbers = #tpu.dot_dimension_numbers<[1], [0], [0], [1], [0, 0, 1, 1], [], []>} : vector<16x32xbf16>, vector<32x32xbf16>, vector<16x32xf32> -> vector<16x32xf32>
    %109 = arith.addf %5, %108 : vector<16x32xf32>
    %110 = vector.broadcast %16 : vector<1x32xf32> to vector<16x32xf32>
    %111 = arith.addf %109, %110 : vector<16x32xf32>
    %112 = arith.negf %111 : vector<16x32xf32>
    %113 = math.exp %112 : vector<16x32xf32>
    %cst_48 = arith.constant 1.000000e+00 : f32
    %114 = vector.broadcast %cst_48 : f32 to vector<16x32xf32>
    %115 = arith.addf %114, %113 : vector<16x32xf32>
    %116 = arith.divf %114, %115 : vector<16x32xf32>
    %117 = arith.mulf %111, %116 : vector<16x32xf32>
    %118 = arith.truncf %117 : vector<16x32xf32> to vector<16x32xbf16>
    %cst_49 = arith.constant dense<0.000000e+00> : vector<16x32xf32>
    %119 = tpu.matmul %118, %11, %cst_49 {dimension_numbers = #tpu.dot_dimension_numbers<[1], [0], [0], [1], [0, 0, 1, 1], [], []>} : vector<16x32xbf16>, vector<32x32xbf16>, vector<16x32xf32> -> vector<16x32xf32>
    %120 = vector.broadcast %17 : vector<1x32xf32> to vector<16x32xf32>
    %121 = arith.addf %119, %120 : vector<16x32xf32>
    %122 = arith.addf %0, %121 : vector<16x32xf32>
    %123 = tpu.concatenate %122, %104, %102, %100 in 1 : vector<16x32xf32>, vector<16x2xf32>, vector<16x2xf32>, vector<16x2xf32> -> vector<16x38xf32>
    %c0_50 = arith.constant 0 : index
    %c0_51 = arith.constant 0 : index
    %124 = vector.load %arg11[%c0_50, %c0_51] : memref<16x38xf32, #tpu.memory_space<vmem>>, vector<16x38xf32>
    tpu.vector_store %arg11[%c0_50, %c0_51], %123 {strides = array<i32>} : memref<16x38xf32, #tpu.memory_space<vmem>>, vector<16x38xf32>,
    return
  }
  func.func @transform_0(%arg0: i32) -> (i32, i32) {
    %c0_i32 = arith.constant 0 : i32
    %c0_i32_0 = arith.constant 0 : i32
    return %arg0, %c0_i32 : i32, i32
  }
  func.func @transform_1(%arg0: i32) -> (i32, i32) {
    %c0_i32 = arith.constant 0 : i32
    %c0_i32_0 = arith.constant 0 : i32
    return %arg0, %c0_i32 : i32, i32
  }
  func.func @transform_2(%arg0: i32) -> (i32, i32, i32) {
    %c0_i32 = arith.constant 0 : i32
    %c0_i32_0 = arith.constant 0 : i32
    %c0_i32_1 = arith.constant 0 : i32
    return %c0_i32, %arg0, %c0_i32_0 : i32, i32, i32
  }
  func.func @transform_3(%arg0: i32) -> (i32, i32, i32) {
    %c0_i32 = arith.constant 0 : i32
    %c0_i32_0 = arith.constant 0 : i32
    %c0_i32_1 = arith.constant 0 : i32
    return %c0_i32, %arg0, %c0_i32_0 : i32, i32, i32
  }
  func.func @transform_4(%arg0: i32) -> (i32, i32, i32) {
    %c0_i32 = arith.constant 0 : i32
    %c0_i32_0 = arith.constant 0 : i32
    %c0_i32_1 = arith.constant 0 : i32
    return %c0_i32, %arg0, %c0_i32_0 : i32, i32, i32
  }
  func.func @transform_5(%arg0: i32) -> (i32, i32) {
    %c0_i32 = arith.constant 0 : i32
    %c0_i32_0 = arith.constant 0 : i32
    %c0_i32_1 = arith.constant 0 : i32
    return %c0_i32, %c0_i32_0 : i32, i32
  }
  func.func @transform_6(%arg0: i32) -> (i32, i32) {
    %c0_i32 = arith.constant 0 : i32
    %c0_i32_0 = arith.constant 0 : i32
    %c0_i32_1 = arith.constant 0 : i32
    return %c0_i32, %c0_i32_0 : i32, i32
  }
  func.func @transform_7(%arg0: i32) -> (i32, i32) {
    %c0_i32 = arith.constant 0 : i32
    %c0_i32_0 = arith.constant 0 : i32
    %c0_i32_1 = arith.constant 0 : i32
    return %c0_i32, %c0_i32_0 : i32, i32
  }
  func.func @transform_8(%arg0: i32) -> (i32, i32) {
    %c0_i32 = arith.constant 0 : i32
    %c0_i32_0 = arith.constant 0 : i32
    %c0_i32_1 = arith.constant 0 : i32
    return %c0_i32, %c0_i32_0 : i32, i32
  }
  func.func @transform_9(%arg0: i32) -> (i32, i32) {
    %c0_i32 = arith.constant 0 : i32
    %c0_i32_0 = arith.constant 0 : i32
    %c0_i32_1 = arith.constant 0 : i32
    return %c0_i32, %c0_i32_0 : i32, i32
  }
  func.func @transform_10(%arg0: i32) -> (i32, i32) {
    %c0_i32 = arith.constant 0 : i32
    %c0_i32_0 = arith.constant 0 : i32
    return %arg0, %c0_i32 : i32, i32
  }
}

</mosaic_0001>

<bundles_post_ra>
// kernel: conv_egnn_forward.1
= control target key start
LH: loop header
LB: loop body
LE: loop exit
PB: predicated region body
PF: predicated region fallthrough
CT: control target
= control target key end

     0   :  { %vm133_vm0 = vcmask 15360   ;;  %vm55_vm1 = vcmask 261120   ;;  %s1905_s26 = smov 32   ;;  %s1907_s29 = smov 64   ;;  %s2851_s5 = inlined_call_operand.vmem [shape: bf16[32,66], index: 5, kind: input, shape index: {}]   ;;  %s2852_s6 = inlined_call_operand.vmem [shape: bf16[160,32], index: 6, kind: input, shape index: {}]   ;;  %s2853_s3 = inlined_call_operand.vmem [shape: f32[4,16,2], index: 3, kind: input, shape index: {}]   ;;  %s2854_s1 = inlined_call_operand.vmem [shape: f32[16,32], index: 1, kind: input, shape index: {}]   ;;  %s2855_s2 = inlined_call_operand.vmem [shape: bf16[4,16,32], index: 2, kind: input, shape index: {}]   ;;  %s2856_s8 = inlined_call_operand.vmem [shape: f32[6,32], index: 8, kind: input, shape index: {}]   ;;  %s2857_s9 = inlined_call_operand.vmem [shape: f32[2,2], index: 9, kind: input, shape index: {}]   ;;  %s2858_s7 = inlined_call_operand.vmem [shape: bf16[32,2], index: 7, kind: input, shape index: {}]   ;;  %s2859_s4 = inlined_call_operand.vmem [shape: f32[4,16,1], index: 4, kind: input, shape index: {}]   ;;  %s2860_s0 = inlined_call_operand.vmem [shape: f32[16,6], index: 0, kind: input, shape index: {}]   ;;  %s2861_s10 = inlined_call_operand.vmem [shape: f32[16,38], index: 10, kind: output, shape index: {}]  }
   0x1   :  { %v1695_v0 = vld [vmem:[%s2851_s5 + $0x8] sm:$0xff]  ;;  %v111_v2 = vld [vmem:[%s2853_s3 + $0x10] sm:$0xff]  ;;  %v109_v4 = vld [vmem:[%s2853_s3] sm:$0xff]  ;;  %s1908_s30 = smov 60  }
   0x2   :  { %v1697_v1 = vld [vmem:[%s2852_s6 + $0x8] sm:$0xff]  ;;  %v127_v3 = vmul.f32 %v111_v2, %v111_v2  ;;  %v1694_v5 = vld [vmem:[%s2851_s5] sm:$0xff]  ;;  %65 = vmatpush.bf16.msra.mxu0 %v1695_v0  ;;  %v125_v6 = vmul.f32 %v109_v4, %v109_v4  ;;  %v112_v11 = vld [vmem:[%s2853_s3 + $0x18] sm:$0xff]  ;;  %s1912_s5 = smov 100  }
   0x3   :  { %304 = vmatpush.bf16.msra.mxu1 %v1697_v1  ;;  %v1696_v7 = vld [vmem:[%s2852_s6] sm:$0xff]  ;;  %v37_v9 = vld [vmem:[%s2854_s1 + $0x8] sm:$0xff]  ;;  %v128_v18 = vmul.f32 %v112_v11, %v112_v11  ;;  %v116_v23 = vld [vmem:[%s2853_s3 + $0x38] sm:$0xff] }
   0x4   :  { %v36_v8 = vld [vmem:[%s2854_s1] sm:$0xff]  ;;  %v140_v10 = vsel %vm133_vm0, %v127_v3, 0.0  ;;  %v110_v12 = vld [vmem:[%s2853_s3 + $0x8] sm:$0xff]  ;;  %v134_v14 = vsel %vm133_vm0, %v125_v6, 0.0  ;;  %v115_v26 = vld [vmem:[%s2853_s3 + $0x30] sm:$0xff]  ;;  %v132_v28 = vmul.f32 %v116_v23, %v116_v23 }
   0x5   :  { %v113_v13 = vld [vmem:[%s2853_s3 + $0x20] sm:$0xff]  ;;  %141 = vadd.xlane.f32.xlu1 %v140_v10  ;;  %135 = vadd.xlane.f32.xlu0 %v134_v14  ;;  %v38_v16 = vpack.c.bf16 %v37_v9, %v36_v8  ;;  %v126_v19 = vmul.f32 %v110_v12, %v110_v12  ;;  %v114_v20 = vld [vmem:[%s2853_s3 + $0x28] sm:$0xff]  ;;  %v143_v24 = vsel %vm133_vm0, %v128_v18, 0.0  ;;  %v131_v29 = vmul.f32 %v115_v26, %v115_v26  ;;  %v1708_v33 = vld [vmem:[%s2855_s2 + $0x10] sm:$0xff] }
   0x6   :  { %v129_v15 = vmul.f32 %v113_v13, %v113_v13  ;;  %v1706_v17 = vld [vmem:[%s2855_s2] sm:$0xff]  ;;  %66 = vmatpush.bf16.msra.mxu0 %v1694_v5  ;;  %v130_v22 = vmul.f32 %v114_v20, %v114_v20  ;;  %v155_v30 = vsel %vm133_vm0, %v132_v28, 0.0  ;;  %v1707_v32 = vld [vmem:[%s2855_s2 + $0x8] sm:$0xff]  ;;  %v1709_v34 = vld [vmem:[%s2855_s2 + $0x18] sm:$0xff] }
   0x7   :  { %305 = vmatpush.bf16.msra.mxu1 %v1696_v7  ;;  %v137_v25 = vsel %vm133_vm0, %v126_v19, 0.0  ;;  %v152_v31 = vsel %vm133_vm0, %v131_v29, 0.0  ;;  %v2062_v63 = vld [vmem:[%s2856_s8] ss:$0 sm:$0xff]  ;;  %v2075_v13 = vld [vmem:[%s2856_s8 + $0x1] ss:$0 sm:$0xff] }
   0x8   :  { %v146_v21 = vsel %vm133_vm0, %v129_v15, 0.0  ;;  %v149_v27 = vsel %vm133_vm0, %v130_v22, 0.0  ;;  %v1699_v29 = vld [vmem:[%s2852_s6 + $0x18] sm:$0xff] }
   0x9   :  { %147 = vadd.xlane.f32.xlu2 %v146_v21  ;;  %1575 = vmatmul.msk.bf16.vlgmr.msra.gmra.mxu0 %vm55_vm1, %v38_v16 }
   0xa   :  { %1600 = vmatmul.msk.bf16.vlgmr.msra.gmra.mxu1 %vm55_vm1, %v1706_v17  ;;  %556 = vmatpush.bf16.msra.mxu2 %v1699_v29 }
   0xd   :  { %144 = vadd.xlane.f32.xlu1 %v143_v24  ;;  %138 = vadd.xlane.f32.xlu0 %v137_v25 }
  0x11   :  { %150 = vadd.xlane.f32.xlu2 %v149_v27 }
  0x15   :  { %156 = vadd.xlane.f32.xlu1 %v155_v30  ;;  %153 = vadd.xlane.f32.xlu0 %v152_v31 }
  0x1a   :  { %1601 = vmatmul.msk.bf16.gmra.mxu1 %vm55_vm1, %v1707_v32 }
  0x2a   :  { %1602 = vmatmul.msk.bf16.gmra.mxu1 %vm55_vm1, %v1708_v33 }
  0x3a   :  { %1603 = vmatmul.msk.bf16.gmra.mxu1 %vm55_vm1, %v1709_v34 }
  0x78   :  { %v2035_v35 = vpop.xlane.xlu1 %141  ;;  %v136_v36 = vpop.xlane.xlu0 %135 }
  0x79   :  { %1731 = vrsqrt.f32 %v2035_v35  ;;  %vm165_vm2 = vcmp.eq.f32.partialorder %v136_v36, inf  ;;  %vm167_vm3 = vcmp.eq.f32.partialorder %v136_v36, 0.0  ;;  %v168_v1 = vand.u32 2147483648, %v136_v36 }
  0x7a   :  { %1733 = vrsqrt.f32 %v136_v36  ;;  %vm189_vm4 = vcmp.eq.f32.partialorder %v2035_v35, inf  ;;  %vm191_vm5 = vcmp.eq.f32.partialorder %v2035_v35, 0.0  ;;  %v192_v24 = vand.u32 2147483648, %v2035_v35 }
  0x7c   :  { %v2038_v37 = vpop.xlane.xlu2 %147 }
  0x7d   :  { %1735 = vrsqrt.f32 %v2038_v37  ;;  %vm213_vm10 = vcmp.eq.f32.partialorder %v2038_v37, inf  ;;  %vm215_vm11 = vcmp.eq.f32.partialorder %v2038_v37, 0.0 }
  0x7f   :  { %v1732_v38 = vpop.eup %1731 }
  0x80   :  { %v1734_v39 = vpop.eup %1733  ;;  %v183_v40 = vmul.f32 %v1732_v38, %v2035_v35  ;;  %v2041_v41 = vpop.xlane.xlu1 %144 }
  0x81   :  { %v159_v42 = vmul.f32 %v1734_v39, %v136_v36  ;;  %1737 = vrsqrt.f32 %v2041_v41  ;;  %v2045_v43 = vpop.xlane.xlu0 %138  ;;  %vm201_vm8 = vcmp.eq.f32.partialorder %v2041_v41, inf  ;;  %vm203_vm9 = vcmp.eq.f32.partialorder %v2041_v41, 0.0 }
  0x82   :  { %1739 = vrsqrt.f32 %v2045_v43  ;;  %v184_v45 = vmul.f32 %v1732_v38, %v183_v40  ;;  %vm177_vm6 = vcmp.eq.f32.partialorder %v2045_v43, inf  ;;  %vm179_vm7 = vcmp.eq.f32.partialorder %v2045_v43, 0.0 }
  0x83   :  { %v160_v44 = vmul.f32 %v1734_v39, %v159_v42  ;;  %v2050_v49 = vpop.eup %1735  ;;  %v180_v27 = vand.u32 2147483648, %v2045_v43 }
  0x84   :  { %v2048_v46 = vpop.xlane.xlu2 %150  ;;  %v185_v48 = vmul.f32 0.5, %v184_v45  ;;  %v207_v57 = vmul.f32 %v2050_v49, %v2038_v37  ;;  %v1698_v45 = vld [vmem:[%s2852_s6 + $0x10] sm:$0xff] }
  0x85   :  { %v161_v47 = vmul.f32 0.5, %v160_v44  ;;  %1741 = vrsqrt.f32 %v2048_v46  ;;  %557 = vmatpush.bf16.msra.mxu2 %v1698_v45  ;;  %vm225_vm12 = vcmp.eq.f32.partialorder %v2048_v46, inf  ;;  %vm227_vm13 = vcmp.eq.f32.partialorder %v2048_v46, 0.0 }
  0x86   :  { %v186_v53 = vsub.f32 1.5, %v185_v48  ;;  %v2057_v59 = vpop.f32.mrf.mxu0  ;;  %v208_v8 = vmul.f32 %v2050_v49, %v207_v57 }
  0x87   :  { %v1738_v50 = vpop.eup %1737  ;;  %v162_v51 = vsub.f32 1.5, %v161_v47  ;;  %v307_v52 = vpop.f32.mrf.mxu1 }
  0x88   :  { %v1740_v54 = vpop.eup %1739  ;;  %v195_v55 = vmul.f32 %v1738_v50, %v2041_v41  ;;  %v187_v60 = vmul.f32 %v1732_v38, %v186_v53  ;;  %v327_v5 = vadd.f32 %v307_v52, %v2057_v59  ;;  %v209_v19 = vmul.f32 0.5, %v208_v8  ;;  %v2088_v25 = vpop.xlane.xlu1 %156 }
  0x89   :  { %v171_v56 = vmul.f32 %v1740_v54, %v2045_v43  ;;  %v163_v58 = vmul.f32 %v1734_v39, %v162_v51  ;;  %v2067_v7 = vpop.xlane.xlu0 %153 }
  0x8a   :  { %v196_v61 = vmul.f32 %v1738_v50, %v195_v55  ;;  %v188_v10 = vmul.f32 %v187_v60, %v2035_v35  ;;  %1743 = vrsqrt.f32 %v2067_v7  ;;  %v210_v33 = vsub.f32 1.5, %v209_v19 }
  0x8b   :  { %v164_v62 = vmul.f32 %v163_v58, %v136_v36  ;;  %v172_v0 = vmul.f32 %v1740_v54, %v171_v56  ;;  %v2064_v3 = vpop.eup %1741  ;;  %1745 = vrsqrt.f32 %v2088_v25  ;;  %vm237_vm14 = vcmp.eq.f32.partialorder %v2067_v7, inf }
  0x8c   :  { %v197_v2 = vmul.f32 0.5, %v196_v61  ;;  %v219_v16 = vmul.f32 %v2064_v3, %v2048_v46  ;;  %v190_v20 = vsel %vm189_vm4, %v2035_v35, %v188_v10  ;;  %vm239_vm15 = vcmp.eq.f32.partialorder %v2067_v7, 0.0 }
  0x8d   :  { %v166_v4 = vsel %vm165_vm2, %v136_v36, %v164_v62  ;;  %v173_v6 = vmul.f32 0.5, %v172_v0  ;;  %v193_v32 = vsel %vm191_vm5, %v192_v24, %v190_v20  ;;  %v228_v24 = vand.u32 2147483648, %v2048_v46 }
  0x8e   :  { %v169_v9 = vsel %vm167_vm3, %v168_v1, %v166_v4  ;;  %v198_v11 = vsub.f32 1.5, %v197_v2  ;;  %v2090_v26 = vpop.f32.mrf.mxu0  ;;  %v220_v28 = vmul.f32 %v2064_v3, %v219_v16  ;;  %v216_v4 = vand.u32 2147483648, %v2038_v37 }
  0x8f   :  { %v336_v12 = vmul.f32 %v2062_v63, %v169_v9  ;;  %v174_v14 = vsub.f32 1.5, %v173_v6  ;;  %v309_v15 = vpop.f32.mrf.mxu1 }
  0x90   :  { %v199_v21 = vmul.f32 %v1738_v50, %v198_v11  ;;  %v2101_v34 = vpop.eup %1743  ;;  %v328_v38 = vadd.f32 %v309_v15, %v2090_v26  ;;  %v221_v44 = vmul.f32 0.5, %v220_v28  ;;  %v211_v50 = vmul.f32 %v2050_v49, %v210_v33 }
  0x91   :  { %v344_v17 = vadd.f32 %v336_v12, %v327_v5  ;;  %v175_v18 = vmul.f32 %v1740_v54, %v174_v14  ;;  %v231_v48 = vmul.f32 %v2101_v34, %v2067_v7  ;;  %v204_v54 = vand.u32 2147483648, %v2041_v41  ;;  %v2121_v55 = vpop.eup %1745 }
  0x92   :  { %v200_v36 = vmul.f32 %v199_v21, %v2041_v41  ;;  %v222_v57 = vsub.f32 1.5, %v221_v44  ;;  %v212_v61 = vmul.f32 %v211_v50, %v2038_v37  ;;  %v243_v2 = vmul.f32 %v2121_v55, %v2088_v25 }
  0x93   :  { %v2083_v22 = vadd.f32 %v2075_v13, %v344_v17  ;;  %v176_v23 = vmul.f32 %v175_v18, %v2045_v43  ;;  %v232_v62 = vmul.f32 %v2101_v34, %v231_v48 }
  0x94   :  { %v202_v52 = vsel %vm201_vm8, %v2041_v41, %v200_v36  ;;  %v223_v8 = vmul.f32 %v2064_v3, %v222_v57  ;;  %v214_v9 = vsel %vm213_vm10, %v2038_v37, %v212_v61  ;;  %v244_v12 = vmul.f32 %v2121_v55, %v243_v2 }
  0x95   :  { %v1604_v30 = vmul.f32 -1.442695, %v2083_v22  ;;  %v178_v31 = vsel %vm177_vm6, %v2045_v43, %v176_v23  ;;  %v338_v43 = vmul.f32 %v2062_v63, %v193_v32  ;;  %v205_v60 = vsel %vm203_vm9, %v204_v54, %v202_v52 }
  0x96   :  { %v181_v35 = vsel %vm179_vm7, %v180_v27, %v178_v31  ;;  %v339_v6 = vmul.f32 %v2062_v63, %v205_v60  ;;  %v233_v10 = vmul.f32 0.5, %v232_v62  ;;  %v217_v15 = vsel %vm215_vm11, %v216_v4, %v214_v9 }
  0x97   :  { %1747 = vpow2.f32 %v1604_v30  ;;  %v337_v39 = vmul.f32 %v2062_v63, %v181_v35  ;;  %v312_v40 = vpop.f32.mrf.mxu1  ;;  %v224_v16 = vmul.f32 %v223_v8, %v2048_v46  ;;  %v340_v23 = vmul.f32 %v2062_v63, %v217_v15 }
  0x98   :  { %v329_v42 = vadd.f32 %v312_v40, %v2057_v59  ;;  %v234_v18 = vsub.f32 1.5, %v233_v10  ;;  %v245_v28 = vmul.f32 0.5, %v244_v12  ;;  %vm249_vm6 = vcmp.eq.f32.partialorder %v2088_v25, inf }
  0x99   :  { %v345_v47 = vadd.f32 %v337_v39, %v328_v38  ;;  %v226_v31 = vsel %vm225_vm12, %v2048_v46, %v224_v16  ;;  %v240_v46 = vand.u32 2147483648, %v2067_v7  ;;  %vm251_vm11 = vcmp.eq.f32.partialorder %v2088_v25, 0.0 }
  0x9a   :  { %v346_v51 = vadd.f32 %v338_v43, %v329_v42  ;;  %v235_v32 = vmul.f32 %v2101_v34, %v234_v18  ;;  %v229_v36 = vsel %vm227_vm13, %v228_v24, %v226_v31  ;;  %v246_v39 = vsub.f32 1.5, %v245_v28 }
  0x9b   :  { %v2118_v53 = vadd.f32 %v2075_v13, %v345_v47  ;;  %v341_v44 = vmul.f32 %v2062_v63, %v229_v36 }
  0x9c   :  { %v2124_v56 = vadd.f32 %v2075_v13, %v346_v51  ;;  %v236_v42 = vmul.f32 %v235_v32, %v2067_v7  ;;  %v247_v51 = vmul.f32 %v2121_v55, %v246_v39 }
  0x9d   :  { %v1748_v58 = vpop.eup %1747  ;;  %v1605_v49 = vmul.f32 -1.442695, %v2118_v53 }
  0x9e   :  { %v2130_v0 = vadd.f32 1.0, %v1748_v58  ;;  %v1606_v1 = vmul.f32 -1.442695, %v2124_v56  ;;  %v248_v16 = vmul.f32 %v247_v51, %v2088_v25 }
  0x9f   :  { %1749 = vpow2.f32 %v1605_v49  ;;  %v314_v41 = vpop.f32.mrf.mxu1  ;;  %v238_v49 = vsel %vm237_vm14, %v2067_v7, %v236_v42 }
  0xa0   :  { %1751 = vrcp.f32 %v2130_v0  ;;  %v330_v5 = vadd.f32 %v314_v41, %v2090_v26  ;;  %v404_v58 = vand.u32 2147483648, %v2130_v0  ;;  %vm398_vm3 = vweird.f32 %v2130_v0 }
  0xa1   :  { %1753 = vpow2.f32 %v1606_v1  ;;  %v402_v60 = vand.u32 2147483647, %v2130_v0  ;;  %v241_v8 = vsel %vm239_vm15, %v240_v46, %v238_v49  ;;  %v250_v31 = vsel %vm249_vm6, %v2088_v25, %v248_v16 }
  0xa2   :  { %v347_v11 = vadd.f32 %v339_v6, %v330_v5  ;;  %v405_v6 = vor.u32 1.1754944e-38, %v404_v58 }
  0xa3   :  { %vm403_vm7 = vcmp.eq.f32.partialorder %v402_v60, 8.507059e+37 }
  0xa4   :  { %v2145_v14 = vadd.f32 %v2075_v13, %v347_v11 }
  0xa5   :  { %v1750_v17 = vpop.eup %1749 }
  0xa6   :  { %v2149_v3 = vpop.eup %1751  ;;  %v2151_v19 = vadd.f32 1.0, %v1750_v17  ;;  %v1607_v37 = vmul.f32 -1.442695, %v2145_v14 }
  0xa7   :  { %v1754_v20 = vpop.eup %1753  ;;  %v317_v21 = vpop.f32.mrf.mxu1  ;;  %v394_v27 = vmul.f32 %v2149_v3, %v2130_v0  ;;  %vm399_vm2 = vweird.f32 %v2149_v3 }
  0xa8   :  { %1755 = vrcp.f32 %v2151_v19  ;;  %v2160_v29 = vadd.f32 1.0, %v1754_v20  ;;  %v331_v30 = vadd.f32 %v317_v21, %v2057_v59  ;;  %vm2194_vm4 = vmor %vm398_vm3, %vm399_vm2  ;;  %v417_v1 = vand.u32 2147483647, %v2151_v19 }
  0xa9   :  { %1757 = vpow2.f32 %v1607_v37  ;;  %v395_v33 = vsub.f32 1.0, %v394_v27  ;;  %v419_v2 = vand.u32 2147483648, %v2151_v19  ;;  %vm413_vm8 = vweird.f32 %v2151_v19 }
  0xaa   :  { %1759 = vrcp.f32 %v2160_v29  ;;  %v348_v35 = vadd.f32 %v340_v23, %v331_v30  ;;  %vm418_vm10 = vcmp.eq.f32.partialorder %v417_v1, 8.507059e+37  ;;  %v252_v27 = vand.u32 2147483648, %v2088_v25 }
  0xab   :  { %v396_v38 = vmul.f32 %v2149_v3, %v395_v33  ;;  %v420_v15 = vor.u32 1.1754944e-38, %v419_v2  ;;  %vm428_vm2 = vweird.f32 %v2160_v29  ;;  %v432_v51 = vand.u32 2147483647, %v2160_v29 }
  0xac   :  { %v2170_v40 = vadd.f32 %v2075_v13, %v348_v35 }
  0xad   :  { %v397_v48 = vadd.f32 %v2149_v3, %v396_v38 }
  0xae   :  { %v1756_v43 = vpop.eup %1755  ;;  %v1608_v34 = vmul.f32 -1.442695, %v2170_v40 }
  0xaf   :  { %v1758_v45 = vpop.eup %1757  ;;  %v319_v47 = vpop.f32.mrf.mxu1  ;;  %v409_v50 = vmul.f32 %v1756_v43, %v2151_v19  ;;  %v401_v41 = vsel %vm2194_vm4, %v2149_v3, %v397_v48  ;;  %vm414_vm5 = vweird.f32 %v1756_v43  ;;  %v342_v19 = vmul.f32 %v2062_v63, %v241_v8 }
  0xb0   :  { %v2182_v52 = vpop.eup %1759  ;;  %v2184_v54 = vadd.f32 1.0, %v1758_v45  ;;  %1761 = vpow2.f32 %v1608_v34  ;;  %v332_v57 = vadd.f32 %v319_v47, %v2090_v26  ;;  %v406_v12 = vsel %vm403_vm7, %v405_v6, %v401_v41  ;;  %vm415_vm9 = vmor %vm413_vm8, %vm414_vm5 }
  0xb1   :  { %v410_v61 = vsub.f32 1.0, %v409_v50  ;;  %v424_v0 = vmul.f32 %v2182_v52, %v2160_v29  ;;  %v513_v23 = vmul.f32 %v406_v12, %v2083_v22  ;;  %vm429_vm13 = vweird.f32 %v2182_v52 }
  0xb2   :  { %1763 = vrcp.f32 %v2184_v54  ;;  %v349_v55 = vadd.f32 %v341_v44, %v332_v57  ;;  %vm443_vm14 = vweird.f32 %v2184_v54  ;;  %v449_v25 = vand.u32 2147483648, %v2184_v54  ;;  %vm430_vm3 = vmor %vm428_vm2, %vm429_vm13 }
  0xb3   :  { %v411_v4 = vmul.f32 %v1756_v43, %v410_v61  ;;  %v425_v37 = vsub.f32 1.0, %v424_v0  ;;  %v447_v46 = vand.u32 2147483647, %v2184_v54  ;;  %v434_v50 = vand.u32 2147483648, %v2160_v29 }
  0xb4   :  { %v2206_v5 = vadd.f32 %v2075_v13, %v349_v55  ;;  %vm433_vm5 = vcmp.eq.f32.partialorder %v432_v51, 8.507059e+37 }
  0xb5   :  { %v412_v9 = vadd.f32 %v1756_v43, %v411_v4  ;;  %v426_v33 = vmul.f32 %v2182_v52, %v425_v37  ;;  %vm448_vm4 = vcmp.eq.f32.partialorder %v447_v46, 8.507059e+37  ;;  %v435_v61 = vor.u32 1.1754944e-38, %v434_v50 }
  0xb6   :  { %v1762_v10 = vpop.eup %1761  ;;  %v1609_v11 = vmul.f32 -1.442695, %v2206_v5 }
  0xb7   :  { %v2214_v17 = vadd.f32 1.0, %v1762_v10  ;;  %v322_v18 = vpop.f32.mrf.mxu1  ;;  %v416_v3 = vsel %vm415_vm9, %v1756_v43, %v412_v9  ;;  %v427_v34 = vadd.f32 %v2182_v52, %v426_v33 }
  0xb8   :  { %v1764_v7 = vpop.eup %1763  ;;  %1765 = vpow2.f32 %v1609_v11  ;;  %v333_v20 = vadd.f32 %v322_v18, %v2057_v59  ;;  %v421_v21 = vsel %vm418_vm10, %v420_v15, %v416_v3 }
  0xb9   :  { %v514_v24 = vmul.f32 %v421_v21, %v2118_v53  ;;  %v439_v28 = vmul.f32 %v1764_v7, %v2184_v54  ;;  %1767 = vrcp.f32 %v2214_v17  ;;  %v253_v53 = vsel %vm251_vm11, %v252_v27, %v250_v31 }
  0xba   :  { %v350_v30 = vadd.f32 %v342_v19, %v333_v20  ;;  %vm444_vm12 = vweird.f32 %v1764_v7  ;;  %v343_v48 = vmul.f32 %v2062_v63, %v253_v53  ;;  %v450_v54 = vor.u32 1.1754944e-38, %v449_v25 }
  0xbb   :  { %v521_v32 = vpack.c.bf16 %v514_v24, %v513_v23  ;;  %v440_v35 = vsub.f32 1.0, %v439_v28  ;;  %vm445_vm15 = vmor %vm443_vm14, %vm444_vm12  ;;  %v431_v49 = vsel %vm430_vm3, %v2182_v52, %v427_v34  ;;  %vm458_vm10 = vweird.f32 %v2214_v17 }
  0xbc   :  { %v2229_v22 = vadd.f32 %v2075_v13, %v350_v30  ;;  %v436_v1 = vsel %vm433_vm5, %v435_v61, %v431_v49  ;;  %v462_v37 = vand.u32 2147483647, %v2214_v17 }
  0xbd   :  { %1620 = vmatmul.msk.bf16.vlgmr.msra.gmra.mxu2 %vm55_vm1, %v521_v32  ;;  %v441_v36 = vmul.f32 %v1764_v7, %v440_v35  ;;  %v515_v6 = vmul.f32 %v436_v1, %v2124_v56  ;;  %v464_v56 = vand.u32 2147483648, %v2214_v17 }
  0xbe   :  { %v1766_v38 = vpop.eup %1765  ;;  %v1610_v39 = vmul.f32 -1.442695, %v2229_v22  ;;  %vm463_vm13 = vcmp.eq.f32.partialorder %v462_v37, 8.507059e+37 }
  0xbf   :  { %v390_v42 = vadd.f32 1.0, %v1766_v38  ;;  %v324_v43 = vpop.f32.mrf.mxu1  ;;  %v442_v44 = vadd.f32 %v1764_v7, %v441_v36  ;;  %v1768_v45 = vpop.eup %1767  ;;  %v465_v23 = vor.u32 1.1754944e-38, %v464_v56 }
  0xc0   :  { %1769 = vpow2.f32 %v1610_v39  ;;  %v334_v47 = vadd.f32 %v324_v43, %v2090_v26  ;;  %v454_v63 = vmul.f32 %v1768_v45, %v2214_v17  ;;  %vm459_vm7 = vweird.f32 %v1768_v45 }
  0xc1   :  { %1771 = vrcp.f32 %v390_v42  ;;  %v446_v57 = vsel %vm445_vm15, %v1764_v7, %v442_v44  ;;  %v479_v15 = vand.u32 2147483648, %v390_v42  ;;  %vm473_vm8 = vweird.f32 %v390_v42  ;;  %vm460_vm11 = vmor %vm458_vm10, %vm459_vm7 }
  0xc2   :  { %v351_v58 = vadd.f32 %v343_v48, %v334_v47  ;;  %v451_v55 = vsel %vm448_vm4, %v450_v54, %v446_v57  ;;  %v455_v0 = vsub.f32 1.0, %v454_v63  ;;  %v477_v18 = vand.u32 2147483647, %v390_v42  ;;  %v2274_v57 = vld [vmem:[%s2856_s8 + $0x2] ss:$0 sm:$0xff]  ;;  %v1701_v63 = vld [vmem:[%s2852_s6 + $0x28] sm:$0xff] }
  0xc3   :  { %v516_v4 = vmul.f32 %v451_v55, %v2145_v14  ;;  %v480_v20 = vor.u32 1.1754944e-38, %v479_v15  ;;  %774 = vmatpush.bf16.msra.mxu3 %v1701_v63 }
  0xc4   :  { %v2249_v60 = vadd.f32 %v2075_v13, %v351_v58  ;;  %v456_v9 = vmul.f32 %v1768_v45, %v455_v0  ;;  %vm478_vm12 = vcmp.eq.f32.partialorder %v477_v18, 8.507059e+37 }
  0xc5   :  { %v522_v8 = vpack.c.bf16 %v516_v4, %v515_v6 }
  0xc6   :  { %v1770_v62 = vpop.eup %1769  ;;  %v1611_v29 = vmul.f32 -1.442695, %v2249_v60  ;;  %v457_v14 = vadd.f32 %v1768_v45, %v456_v9 }
  0xc7   :  { %v1772_v2 = vpop.eup %1771  ;;  %v2252_v41 = vadd.f32 1.0, %v1770_v62 }
  0xc8   :  { %1773 = vpow2.f32 %v1611_v29  ;;  %v469_v52 = vmul.f32 %v1772_v2, %v390_v42  ;;  %vm474_vm6 = vweird.f32 %v1772_v2  ;;  %v461_v19 = vsel %vm460_vm11, %v1768_v45, %v457_v14 }
  0xc9   :  { %1775 = vrcp.f32 %v2252_v41  ;;  %vm475_vm9 = vmor %vm473_vm8, %vm474_vm6  ;;  %v466_v27 = vsel %vm463_vm13, %v465_v23, %v461_v19  ;;  %v494_v43 = vand.u32 2147483648, %v2252_v41  ;;  %vm488_vm4 = vweird.f32 %v2252_v41 }
  0xca   :  { %v470_v13 = vsub.f32 1.0, %v469_v52  ;;  %v517_v33 = vmul.f32 %v466_v27, %v2170_v40  ;;  %v492_v40 = vand.u32 2147483647, %v2252_v41 }
  0xcb   :  { %v495_v46 = vor.u32 1.1754944e-38, %v494_v43 }
  0xcc   :  { %v471_v10 = vmul.f32 %v1772_v2, %v470_v13  ;;  %vm493_vm7 = vcmp.eq.f32.partialorder %v492_v40, 8.507059e+37 }
  0xcd   :  { %1621 = vmatmul.msk.bf16.gmra.mxu2 %vm55_vm1, %v522_v8 }
  0xce   :  { %v1774_v11 = vpop.eup %1773  ;;  %v472_v12 = vadd.f32 %v1772_v2, %v471_v10 }
  0xcf   :  { %v392_v16 = vadd.f32 1.0, %v1774_v11  ;;  %v1776_v3 = vpop.eup %1775 }
  0xd0   :  { %v476_v7 = vsel %vm475_vm9, %v1772_v2, %v472_v12  ;;  %v484_v21 = vmul.f32 %v1776_v3, %v2252_v41  ;;  %vm489_vm15 = vweird.f32 %v1776_v3 }
  0xd1   :  { %1777 = vrcp.f32 %v392_v16  ;;  %v481_v24 = vsel %vm478_vm12, %v480_v20, %v476_v7  ;;  %v509_v39 = vand.u32 2147483648, %v392_v16  ;;  %vm503_vm2 = vweird.f32 %v392_v16  ;;  %vm490_vm5 = vmor %vm488_vm4, %vm489_vm15 }
  0xd2   :  { %v518_v30 = vmul.f32 %v481_v24, %v2206_v5  ;;  %v485_v31 = vsub.f32 1.0, %v484_v21  ;;  %v507_v42 = vand.u32 2147483647, %v392_v16 }
  0xd3   :  { %v510_v34 = vor.u32 1.1754944e-38, %v509_v39 }
  0xd4   :  { %v523_v17 = vpack.c.bf16 %v518_v30, %v517_v33  ;;  %v486_v53 = vmul.f32 %v1776_v3, %v485_v31  ;;  %vm508_vm6 = vcmp.eq.f32.partialorder %v507_v42, 8.507059e+37 }
  0xd6   :  { %v487_v25 = vadd.f32 %v1776_v3, %v486_v53 }
  0xd7   :  { %v1778_v28 = vpop.eup %1777 }
  0xd8   :  { %v499_v32 = vmul.f32 %v1778_v28, %v392_v16  ;;  %vm504_vm14 = vweird.f32 %v1778_v28  ;;  %v491_v44 = vsel %vm490_vm5, %v1776_v3, %v487_v25 }
  0xd9   :  { %vm505_vm3 = vmor %vm503_vm2, %vm504_vm14  ;;  %v496_v47 = vsel %vm493_vm7, %v495_v46, %v491_v44 }
  0xda   :  { %v500_v35 = vsub.f32 1.0, %v499_v32  ;;  %v519_v50 = vmul.f32 %v496_v47, %v2229_v22 }
  0xdc   :  { %v501_v36 = vmul.f32 %v1778_v28, %v500_v35 }
  0xdd   :  { %1622 = vmatmul.msk.bf16.gmra.mxu2 %vm55_vm1, %v523_v17 }
  0xde   :  { %v502_v38 = vadd.f32 %v1778_v28, %v501_v36 }
  0xe0   :  { %v506_v5 = vsel %vm505_vm3, %v1778_v28, %v502_v38 }
  0xe1   :  { %v511_v45 = vsel %vm508_vm6, %v510_v34, %v506_v5 }
  0xe2   :  { %v520_v48 = vmul.f32 %v511_v45, %v2249_v60  ;;  %v1700_v60 = vld [vmem:[%s2852_s6 + $0x20] sm:$0xff] }
  0xe3   :  { %775 = vmatpush.bf16.msra.mxu3 %v1700_v60 }
  0xe4   :  { %v524_v51 = vpack.c.bf16 %v520_v48, %v519_v50 }
  0xed   :  { %1623 = vmatmul.msk.bf16.gmra.mxu2 %vm55_vm1, %v524_v51 }
 0x140   :  { %v559_v58 = vpop.f32.mrf.mxu2 }
 0x141   :  { %v2277_v54 = vadd.f32 %v2274_v57, %v559_v58 }
 0x143   :  { %v1624_v49 = vmul.f32 -1.442695, %v2277_v54 }
 0x145   :  { %1779 = vpow2.f32 %v1624_v49 }
 0x148   :  { %v561_v22 = vpop.f32.mrf.mxu2 }
 0x149   :  { %v562_v61 = vadd.f32 %v2274_v57, %v561_v22 }
 0x14b   :  { %v1780_v55 = vpop.eup %1779  ;;  %v1625_v62 = vmul.f32 -1.442695, %v562_v61 }
 0x14c   :  { %v603_v29 = vadd.f32 1.0, %v1780_v55 }
 0x14d   :  { %1781 = vpow2.f32 %v1625_v62 }
 0x14e   :  { %1783 = vrcp.f32 %v603_v29  ;;  %v622_v3 = vand.u32 2147483648, %v603_v29  ;;  %vm616_vm9 = vweird.f32 %v603_v29  ;;  %v620_v37 = vand.u32 2147483647, %v603_v29 }
 0x150   :  { %v564_v1 = vpop.f32.mrf.mxu2  ;;  %v623_v30 = vor.u32 1.1754944e-38, %v622_v3  ;;  %vm621_vm13 = vcmp.eq.f32.partialorder %v620_v37, 8.507059e+37 }
 0x151   :  { %v2288_v2 = vadd.f32 %v2274_v57, %v564_v1 }
 0x153   :  { %v1782_v41 = vpop.eup %1781  ;;  %v1626_v4 = vmul.f32 -1.442695, %v2288_v2 }
 0x154   :  { %v1784_v0 = vpop.eup %1783  ;;  %v604_v52 = vadd.f32 1.0, %v1782_v41 }
 0x155   :  { %v612_v6 = vmul.f32 %v1784_v0, %v603_v29  ;;  %1785 = vpow2.f32 %v1626_v4  ;;  %vm617_vm8 = vweird.f32 %v1784_v0 }
 0x156   :  { %1787 = vrcp.f32 %v604_v52  ;;  %v635_v7 = vand.u32 2147483647, %v604_v52  ;;  %v637_v20 = vand.u32 2147483648, %v604_v52  ;;  %vm2298_vm10 = vmor %vm616_vm9, %vm617_vm8  ;;  %vm631_vm12 = vweird.f32 %v604_v52 }
 0x157   :  { %v613_v13 = vsub.f32 1.0, %v612_v6 }
 0x158   :  { %v566_v8 = vpop.f32.mrf.mxu2  ;;  %vm636_vm15 = vcmp.eq.f32.partialorder %v635_v7, 8.507059e+37  ;;  %v638_v35 = vor.u32 1.1754944e-38, %v637_v20 }
 0x159   :  { %v2292_v9 = vadd.f32 %v2274_v57, %v566_v8  ;;  %v614_v10 = vmul.f32 %v1784_v0, %v613_v13 }
 0x15b   :  { %v1786_v11 = vpop.eup %1785  ;;  %v1627_v12 = vmul.f32 -1.442695, %v2292_v9  ;;  %v615_v18 = vadd.f32 %v1784_v0, %v614_v10 }
 0x15c   :  { %v1788_v15 = vpop.eup %1787  ;;  %v2295_v16 = vadd.f32 1.0, %v1786_v11 }
 0x15d   :  { %v627_v14 = vmul.f32 %v1788_v15, %v604_v52  ;;  %1789 = vpow2.f32 %v1627_v12  ;;  %vm632_vm11 = vweird.f32 %v1788_v15  ;;  %v619_v27 = vsel %vm2298_vm10, %v1784_v0, %v615_v18 }
 0x15e   :  { %1791 = vrcp.f32 %v2295_v16  ;;  %vm633_vm14 = vmor %vm631_vm12, %vm632_vm11  ;;  %v624_v53 = vsel %vm621_vm13, %v623_v30, %v619_v27  ;;  %v652_v58 = vand.u32 2147483648, %v2295_v16  ;;  %vm646_vm3 = vweird.f32 %v2295_v16 }
 0x15f   :  { %v628_v56 = vsub.f32 1.0, %v627_v14  ;;  %v2312_v43 = vmul.f32 %v624_v53, %v2277_v54  ;;  %v650_v49 = vand.u32 2147483647, %v2295_v16  ;;  %v1703_v14 = vld [vmem:[%s2852_s6 + $0x38] sm:$0xff] }
 0x160   :  { %v569_v19 = vpop.f32.mrf.mxu2  ;;  %v653_v41 = vor.u32 1.1754944e-38, %v652_v58  ;;  %1431 = vmatpush.bf16.msrb.mxu1 %v1703_v14 }
 0x161   :  { %v629_v23 = vmul.f32 %v1788_v15, %v628_v56  ;;  %v2303_v24 = vadd.f32 %v2274_v57, %v569_v19  ;;  %vm651_vm7 = vcmp.eq.f32.partialorder %v650_v49, 8.507059e+37  ;;  %v1702_v19 = vld [vmem:[%s2852_s6 + $0x30] sm:$0xff] }
 0x163   :  { %v1790_v28 = vpop.eup %1789  ;;  %v630_v31 = vadd.f32 %v1788_v15, %v629_v23  ;;  %v1628_v32 = vmul.f32 -1.442695, %v2303_v24 }
 0x164   :  { %v1792_v33 = vpop.eup %1791  ;;  %v606_v17 = vadd.f32 1.0, %v1790_v28  ;;  %1432 = vmatpush.bf16.msrb.mxu1 %v1702_v19  ;;  %v1727_v19 = vld [vmem:[%s2856_s8 + $0x4] ss:$0 sm:$0xff] }
 0x165   :  { %v634_v36 = vsel %vm633_vm14, %v1788_v15, %v630_v31  ;;  %v642_v38 = vmul.f32 %v1792_v33, %v2295_v16  ;;  %1793 = vpow2.f32 %v1628_v32  ;;  %vm647_vm2 = vweird.f32 %v1792_v33  ;;  %1451 = vrot.lane.b32.xlu1 %v1727_v19, %s1905_s26 }
 0x166   :  { %v639_v39 = vsel %vm636_vm15, %v638_v35, %v634_v36  ;;  %1795 = vrcp.f32 %v606_v17  ;;  %v665_v63 = vand.u32 2147483647, %v606_v17  ;;  %v667_v22 = vand.u32 2147483648, %v606_v17  ;;  %vm2327_vm4 = vmor %vm646_vm3, %vm647_vm2 }
 0x167   :  { %v2309_v25 = vmul.f32 %v639_v39, %v562_v61  ;;  %v643_v42 = vsub.f32 1.0, %v642_v38  ;;  %vm661_vm6 = vweird.f32 %v606_v17 }
 0x168   :  { %v571_v40 = vpop.f32.mrf.mxu2  ;;  %vm666_vm9 = vcmp.eq.f32.partialorder %v665_v63, 8.507059e+37  ;;  %v668_v6 = vor.u32 1.1754944e-38, %v667_v22 }
 0x169   :  { %v2315_v5 = vadd.f32 %v2274_v57, %v571_v40  ;;  %v644_v34 = vmul.f32 %v1792_v33, %v643_v42  ;;  %v739_v44 = vpack.c.bf16 %v2309_v25, %v2312_v43 }
 0x16b   :  { %v1794_v46 = vpop.eup %1793  ;;  %v1629_v45 = vmul.f32 -1.442695, %v2315_v5  ;;  %1640 = vmatmul.msk.bf16.vlgmr.msra.gmra.mxu3 %vm55_vm1, %v739_v44  ;;  %v645_v51 = vadd.f32 %v1792_v33, %v644_v34 }
 0x16c   :  { %v1796_v47 = vpop.eup %1795  ;;  %v2320_v48 = vadd.f32 1.0, %v1794_v46 }
 0x16d   :  { %v657_v50 = vmul.f32 %v1796_v47, %v606_v17  ;;  %1797 = vpow2.f32 %v1629_v45  ;;  %vm662_vm5 = vweird.f32 %v1796_v47  ;;  %v649_v29 = vsel %vm2327_vm4, %v1792_v33, %v645_v51 }
 0x16e   :  { %1799 = vrcp.f32 %v2320_v48  ;;  %vm663_vm8 = vmor %vm661_vm6, %vm662_vm5  ;;  %v654_v8 = vsel %vm651_vm7, %v653_v41, %v649_v29  ;;  %vm676_vm11 = vweird.f32 %v2320_v48  ;;  %v680_v28 = vand.u32 2147483647, %v2320_v48 }
 0x16f   :  { %v658_v54 = vsub.f32 1.0, %v657_v50  ;;  %v2345_v18 = vmul.f32 %v654_v8, %v2288_v2 }
 0x170   :  { %v574_v60 = vpop.f32.mrf.mxu2  ;;  %vm681_vm14 = vcmp.eq.f32.partialorder %v680_v28, 8.507059e+37 }
 0x171   :  { %v659_v55 = vmul.f32 %v1796_v47, %v658_v54  ;;  %v2332_v62 = vadd.f32 %v2274_v57, %v574_v60  ;;  %v1396_v41 = vsel %vm55_vm1, %v2345_v18, 0.0 }
 0x173   :  { %v1798_v1 = vpop.eup %1797  ;;  %v660_v4 = vadd.f32 %v1796_v47, %v659_v55  ;;  %v1630_v0 = vmul.f32 -1.442695, %v2332_v62 }
 0x174   :  { %v1800_v52 = vpop.eup %1799  ;;  %v608_v13 = vadd.f32 1.0, %v1798_v1 }
 0x175   :  { %v664_v10 = vsel %vm663_vm8, %v1796_v47, %v660_v4  ;;  %v672_v11 = vmul.f32 %v1800_v52, %v2320_v48  ;;  %1801 = vpow2.f32 %v1630_v0  ;;  %vm677_vm10 = vweird.f32 %v1800_v52 }
 0x176   :  { %v669_v12 = vsel %vm666_vm9, %v668_v6, %v664_v10  ;;  %1803 = vrcp.f32 %v608_v13  ;;  %vm678_vm12 = vmor %vm676_vm11, %vm677_vm10  ;;  %v697_v31 = vand.u32 2147483648, %v608_v13  ;;  %v695_v35 = vand.u32 2147483647, %v608_v13 }
 0x177   :  { %v2339_v15 = vmul.f32 %v669_v12, %v2292_v9  ;;  %v673_v16 = vsub.f32 1.0, %v672_v11  ;;  %vm691_vm15 = vweird.f32 %v608_v13  ;;  %v1395_v6 = vsel %vm55_vm1, %v2312_v43, 0.0 }
 0x178   :  { %v576_v3 = vpop.f32.mrf.mxu2  ;;  %v698_v42 = vor.u32 1.1754944e-38, %v697_v31  ;;  %vm696_vm3 = vcmp.eq.f32.partialorder %v695_v35, 8.507059e+37 }
 0x179   :  { %v674_v56 = vmul.f32 %v1800_v52, %v673_v16  ;;  %v2348_v37 = vadd.f32 %v2274_v57, %v576_v3  ;;  %v740_v7 = vpack.c.bf16 %v2339_v15, %v2345_v18  ;;  %v682_v57 = vand.u32 2147483648, %v2320_v48 }
 0x17a   :  { %v1403_v4 = vsel %vm55_vm1, %v2339_v15, 0.0  ;;  %v1397_v16 = vadd.f32 %v1396_v41, %v1395_v6 }
 0x17b   :  { %v1802_v20 = vpop.eup %1801  ;;  %v1631_v9 = vmul.f32 -1.442695, %v2348_v37  ;;  %1641 = vmatmul.msk.bf16.gmra.mxu3 %vm55_vm1, %v740_v7  ;;  %v675_v2 = vadd.f32 %v1800_v52, %v674_v56  ;;  %v683_v17 = vor.u32 1.1754944e-38, %v682_v57  ;;  %v1710_v57 = vld [vmem:[%s2858_s7] sm:$0xff] }
 0x17c   :  { %v1804_v21 = vpop.eup %1803  ;;  %v609_v23 = vadd.f32 1.0, %v1802_v20 }
 0x17d   :  { %v687_v27 = vmul.f32 %v1804_v21, %v608_v13  ;;  %1805 = vpow2.f32 %v1631_v9  ;;  %v679_v32 = vsel %vm678_vm12, %v1800_v52, %v675_v2  ;;  %vm692_vm13 = vweird.f32 %v1804_v21 }
 0x17e   :  { %1807 = vrcp.f32 %v609_v23  ;;  %v684_v39 = vsel %vm681_vm14, %v683_v17, %v679_v32  ;;  %vm693_vm2 = vmor %vm691_vm15, %vm692_vm13  ;;  %v712_v58 = vand.u32 2147483648, %v609_v23  ;;  %vm706_vm5 = vweird.f32 %v609_v23 }
 0x17f   :  { %v688_v30 = vsub.f32 1.0, %v687_v27  ;;  %v735_v45 = vmul.f32 %v684_v39, %v2303_v24  ;;  %v710_v49 = vand.u32 2147483647, %v609_v23  ;;  %v1402_v13 = vsel %vm55_vm1, %v2309_v25, 0.0  ;;  %v1711_v27 = vld [vmem:[%s2858_s7 + $0x8] sm:$0xff] }
 0x180   :  { %v713_v61 = vor.u32 1.1754944e-38, %v712_v58  ;;  %v1404_v15 = vadd.f32 %v1403_v4, %v1402_v13  ;;  %996 = vmatpush.bf16.msrb.mxu0 %v1711_v27  ;;  %vm1249_vm12 = vcmask 7168   ;;  %v2442_v13 = vld [vmem:[%s2859_s4 + $0x20] sm:$0xff] }
 0x181   :  { %v689_v33 = vmul.f32 %v1804_v21, %v688_v30  ;;  %vm711_vm7 = vcmp.eq.f32.partialorder %v710_v49, 8.507059e+37  ;;  %v1398_v10 = vsel %vm55_vm1, %v735_v45, 0.0  ;;  %v2415_v49 = vld [vmem:[%s2859_s4] sm:$0xff] }
 0x182   :  { %v1399_v3 = vadd.f32 %v1398_v10, %v1397_v16  ;;  %v1250_v41 = vsel %vm1249_vm12, %v2415_v49, 0.0 }
 0x183   :  { %v1806_v53 = vpop.eup %1805  ;;  %v690_v36 = vadd.f32 %v1804_v21, %v689_v33 }
 0x184   :  { %v1808_v38 = vpop.eup %1807  ;;  %v610_v40 = vadd.f32 1.0, %v1806_v53  ;;  %997 = vmatpush.bf16.msrb.mxu0 %v1710_v57 }
 0x185   :  { %v694_v34 = vsel %vm693_vm2, %v1804_v21, %v690_v36  ;;  %v702_v44 = vmul.f32 %v1808_v38, %v609_v23  ;;  %vm707_vm4 = vweird.f32 %v1808_v38 }
 0x186   :  { %v699_v46 = vsel %vm696_vm3, %v698_v42, %v694_v34  ;;  %1809 = vrcp.f32 %v610_v40  ;;  %vm708_vm6 = vmor %vm706_vm5, %vm707_vm4  ;;  %v727_v29 = vand.u32 2147483648, %v610_v40  ;;  %v725_v1 = vand.u32 2147483647, %v610_v40 }
 0x187   :  { %v736_v47 = vmul.f32 %v699_v46, %v2315_v5  ;;  %v703_v48 = vsub.f32 1.0, %v702_v44  ;;  %vm721_vm9 = vweird.f32 %v610_v40 }
 0x188   :  { %v728_v8 = vor.u32 1.1754944e-38, %v727_v29  ;;  %vm726_vm11 = vcmp.eq.f32.partialorder %v725_v1, 8.507059e+37 }
 0x189   :  { %v704_v50 = vmul.f32 %v1808_v38, %v703_v48  ;;  %v741_v51 = vpack.c.bf16 %v736_v47, %v735_v45  ;;  %v1405_v11 = vsel %vm55_vm1, %v736_v47, 0.0 }
 0x18a   :  { %v1406_v43 = vadd.f32 %v1405_v11, %v1404_v15 }
 0x18b   :  { %v705_v54 = vadd.f32 %v1808_v38, %v704_v50  ;;  %1642 = vmatmul.msk.bf16.gmra.mxu3 %vm55_vm1, %v741_v51 }
 0x18c   :  { %v1810_v63 = vpop.eup %1809 }
 0x18d   :  { %v709_v22 = vsel %vm708_vm6, %v1808_v38, %v705_v54  ;;  %v717_v60 = vmul.f32 %v1810_v63, %v610_v40  ;;  %vm722_vm8 = vweird.f32 %v1810_v63  ;;  %v1906_v40 = vmov 0  }
 0x18e   :  { %v714_v24 = vsel %vm711_vm7, %v713_v61, %v709_v22  ;;  %vm723_vm10 = vmor %vm721_vm9, %vm722_vm8  ;;  %1720 = vset.pattern.permute.xlu2 %v1906_v40  ;;  %1721 = vset.pattern.permute.xlu0 %v1906_v40  ;;  %v118_v22 = vld [vmem:[%s2859_s4 + $0x8] sm:$0xff] }
 0x18f   :  { %v718_v55 = vsub.f32 1.0, %v717_v60  ;;  %v737_v0 = vmul.f32 %v714_v24, %v2332_v62  ;;  %1722 = vset.pattern.permute.xlu1 %v1906_v40 }
 0x190   :  { %1194 = vperm.xlu1 %1722, %v118_v22  }
 0x191   :  { %v719_v5 = vmul.f32 %v1810_v63, %v718_v55  ;;  %v1400_v62 = vsel %vm55_vm1, %v737_v0, 0.0 }
 0x192   :  { %v1401_v7 = vadd.f32 %v1400_v62, %v1399_v3  ;;  %v1253_v3 = vsel %vm1249_vm12, %v2442_v13, 0.0 }
 0x193   :  { %v720_v52 = vadd.f32 %v1810_v63, %v719_v5 }
 0x195   :  { %v724_v12 = vsel %vm723_vm10, %v1810_v63, %v720_v52  ;;  %v2420_v63 = vld [vmem:[%s2859_s4 + $0x10] sm:$0xff] }
 0x196   :  { %v729_v14 = vsel %vm726_vm11, %v728_v8, %v724_v12  ;;  %v1251_v4 = vsel %vm1249_vm12, %v2420_v63, 0.0 }
 0x197   :  { %v738_v18 = vmul.f32 %v729_v14, %v2348_v37  ;;  %v2386_v37 = vld [vmem:[%s2856_s8 + $0x3] ss:$0 sm:$0xff]  ;;  %v1252_v16 = vadd.f32 %v1251_v4, %v1250_v41 }
 0x199   :  { %v1407_v56 = vsel %vm55_vm1, %v738_v18, 0.0  ;;  %v742_v25 = vpack.c.bf16 %v738_v18, %v737_v0 }
 0x19a   :  { %v1408_v20 = vadd.f32 %v1407_v56, %v1406_v43 }
 0x19b   :  { %1643 = vmatmul.msk.bf16.gmra.mxu3 %vm55_vm1, %v742_v25  ;;  %v123_v25 = vld [vmem:[%s2859_s4 + $0x30] sm:$0xff] }
 0x19c   :  { %v1409_v9 = vpack.c.bf16 %v1408_v20, %v1401_v7  ;;  %v120_v7 = vld [vmem:[%s2859_s4 + $0x18] sm:$0xff]  ;;  %v1255_v57 = vsel %vm1249_vm12, %v123_v25, 0.0 }
 0x19d   :  { %1204 = vperm.xlu1 %1722, %v120_v7  }
 0x19e   :  { %1682 = vmatmul.msk.bf16.vlgmr.msrb.gmra.mxu1 %vm55_vm1, %v1409_v9 }
 0x1a5   :  { %1219 = vperm.xlu1 %1722, %v123_v25  }
 0x1ee   :  { %v777_v21 = vpop.f32.mrf.mxu3 }
 0x1ef   :  { %v2389_v23 = vadd.f32 %v2386_v37, %v777_v21 }
 0x1f1   :  { %v1644_v2 = vmul.f32 -1.442695, %v2389_v23 }
 0x1f3   :  { %1811 = vpow2.f32 %v1644_v2  ;;  %v1254_v2 = vadd.f32 %v1253_v3, %v1252_v16 }
 0x1f6   :  { %v779_v28 = vpop.f32.mrf.mxu3 }
 0x1f7   :  { %v2399_v30 = vadd.f32 %v2386_v37, %v779_v28  ;;  %v1257_v28 = vsel %vm1249_vm12, %v118_v22, 0.0 }
 0x1f9   :  { %v1812_v31 = vpop.eup %1811  ;;  %v1645_v32 = vmul.f32 -1.442695, %v2399_v30 }
 0x1fa   :  { %v821_v33 = vadd.f32 1.0, %v1812_v31 }
 0x1fb   :  { %1813 = vpow2.f32 %v1645_v32 }
 0x1fc   :  { %1815 = vrcp.f32 %v821_v33  ;;  %v838_v60 = vand.u32 2147483647, %v821_v33  ;;  %v840_v61 = vand.u32 2147483648, %v821_v33  ;;  %vm834_vm14 = vweird.f32 %v821_v33 }
 0x1fe   :  { %v782_v35 = vpop.f32.mrf.mxu3  ;;  %vm839_vm3 = vcmp.eq.f32.partialorder %v838_v60, 8.507059e+37  ;;  %v841_v8 = vor.u32 1.1754944e-38, %v840_v61 }
 0x1ff   :  { %v2403_v17 = vadd.f32 %v2386_v37, %v782_v35  ;;  %v2471_v35 = vld [vmem:[%s2859_s4 + $0x28] sm:$0xff] }
 0x201   :  { %v1814_v53 = vpop.eup %1813  ;;  %v1646_v36 = vmul.f32 -1.442695, %v2403_v17 }
 0x202   :  { %v1816_v38 = vpop.eup %1815  ;;  %v822_v39 = vadd.f32 1.0, %v1814_v53 }
 0x203   :  { %v830_v42 = vmul.f32 %v1816_v38, %v821_v33  ;;  %1817 = vpow2.f32 %v1646_v36  ;;  %vm835_vm13 = vweird.f32 %v1816_v38  ;;  %v1256_v36 = vadd.f32 %v1255_v57, %v1254_v2 }
 0x204   :  { %1819 = vrcp.f32 %v822_v39  ;;  %vm2426_vm15 = vmor %vm834_vm14, %vm835_vm13  ;;  %v853_v29 = vand.u32 2147483647, %v822_v39  ;;  %v855_v5 = vand.u32 2147483648, %v822_v39  ;;  %vm849_vm4 = vweird.f32 %v822_v39 }
 0x205   :  { %v831_v34 = vsub.f32 1.0, %v830_v42 }
 0x206   :  { %v784_v44 = vpop.f32.mrf.mxu3  ;;  %v856_v62 = vor.u32 1.1754944e-38, %v855_v5  ;;  %vm854_vm6 = vcmp.eq.f32.partialorder %v853_v29, 8.507059e+37 }
 0x207   :  { %v832_v46 = vmul.f32 %v1816_v38, %v831_v34  ;;  %v2407_v45 = vadd.f32 %v2386_v37, %v784_v44  ;;  %v1260_v34 = vsel %vm1249_vm12, %v2471_v35, 0.0 }
 0x209   :  { %v1818_v47 = vpop.eup %1817  ;;  %v1647_v48 = vmul.f32 -1.442695, %v2407_v45  ;;  %v833_v58 = vadd.f32 %v1816_v38, %v832_v46 }
 0x20a   :  { %v1820_v50 = vpop.eup %1819  ;;  %v2410_v51 = vadd.f32 1.0, %v1818_v47  ;;  %v2487_v47 = vld [vmem:[%s2859_s4 + $0x38] sm:$0xff] }
 0x20b   :  { %v845_v54 = vmul.f32 %v1820_v50, %v822_v39  ;;  %1821 = vpow2.f32 %v1647_v48  ;;  %v837_v0 = vsel %vm2426_vm15, %v1816_v38, %v833_v58  ;;  %vm850_vm2 = vweird.f32 %v1820_v50 }
 0x20c   :  { %1823 = vrcp.f32 %v2410_v51  ;;  %v842_v14 = vsel %vm839_vm3, %v841_v8, %v837_v0  ;;  %vm851_vm5 = vmor %vm849_vm4, %vm850_vm2  ;;  %v870_v48 = vand.u32 2147483648, %v2410_v51  ;;  %vm864_vm8 = vweird.f32 %v2410_v51 }
 0x20d   :  { %v846_v55 = vsub.f32 1.0, %v845_v54  ;;  %v949_v9 = vmul.f32 %v842_v14, %v2389_v23  ;;  %v1258_v23 = vsel %vm1249_vm12, %v120_v7, 0.0  ;;  %v1264_v54 = vadd.f32 1e-06, %v1256_v36 }
 0x20e   :  { %v787_v1 = vpop.f32.mrf.mxu3  ;;  %v1259_v40 = vadd.f32 %v1258_v23, %v1257_v28  ;;  %v1262_v29 = vsel %vm1249_vm12, %v2487_v47, 0.0  ;;  %v871_v41 = vor.u32 1.1754944e-38, %v870_v48 }
 0x20f   :  { %v847_v52 = vmul.f32 %v1820_v50, %v846_v55  ;;  %v2437_v6 = vadd.f32 %v2386_v37, %v787_v1 }
 0x210   :  { %v1261_v24 = vadd.f32 %v1260_v34, %v1259_v40 }
 0x211   :  { %v1822_v10 = vpop.eup %1821  ;;  %v848_v11 = vadd.f32 %v1820_v50, %v847_v52  ;;  %v1648_v12 = vmul.f32 -1.442695, %v2437_v6 }
 0x212   :  { %v2445_v15 = vpop.eup %1823  ;;  %v2447_v18 = vadd.f32 1.0, %v1822_v10 }
 0x213   :  { %v852_v43 = vsel %vm851_vm5, %v1820_v50, %v848_v11  ;;  %v860_v56 = vmul.f32 %v2445_v15, %v2410_v51  ;;  %1825 = vpow2.f32 %v1648_v12  ;;  %vm865_vm7 = vweird.f32 %v2445_v15 }
 0x214   :  { %v857_v20 = vsel %vm854_vm6, %v856_v62, %v852_v43  ;;  %1827 = vrcp.f32 %v2447_v18  ;;  %v868_v50 = vand.u32 2147483647, %v2410_v51  ;;  %vm2493_vm9 = vmor %vm864_vm8, %vm865_vm7  ;;  %v883_v60 = vand.u32 2147483647, %v2447_v18 }
 0x215   :  { %v950_v19 = vmul.f32 %v857_v20, %v2399_v30  ;;  %v861_v21 = vsub.f32 1.0, %v860_v56  ;;  %v885_v61 = vand.u32 2147483648, %v2447_v18  ;;  %vm879_vm13 = vweird.f32 %v2447_v18 }
 0x216   :  { %v789_v27 = vpop.f32.mrf.mxu3  ;;  %vm869_vm11 = vcmp.eq.f32.partialorder %v868_v50, 8.507059e+37  ;;  %vm884_vm14 = vcmp.eq.f32.partialorder %v883_v60, 8.507059e+37 }
 0x217   :  { %v957_v31 = vpack.c.bf16 %v950_v19, %v949_v9  ;;  %v862_v32 = vmul.f32 %v2445_v15, %v861_v21  ;;  %v2466_v33 = vadd.f32 %v2386_v37, %v789_v27  ;;  %v886_v11 = vor.u32 1.1754944e-38, %v885_v61 }
 0x219   :  { %v1826_v30 = vpop.eup %1825  ;;  %v1649_v53 = vmul.f32 -1.442695, %v2466_v33  ;;  %1660 = vmatmul.msk.bf16.vlgmr.msrb.gmra.mxu0 %vm55_vm1, %v957_v31  ;;  %v863_v44 = vadd.f32 %v2445_v15, %v862_v32 }
 0x21a   :  { %v1828_v38 = vpop.eup %1827  ;;  %v2476_v39 = vadd.f32 1.0, %v1826_v30 }
 0x21b   :  { %v1434_v42 = vpop.f32.mrf.mxu1  ;;  %v875_v46 = vmul.f32 %v1828_v38, %v2447_v18  ;;  %1829 = vpow2.f32 %v1649_v53  ;;  %v867_v5 = vsel %vm2493_vm9, %v2445_v15, %v863_v44  ;;  %vm880_vm10 = vweird.f32 %v1828_v38 }
 0x21c   :  { %1441 = vrot.lane.b32.xlu2 %v1434_v42, %s1905_s26  ;;  %1831 = vrcp.f32 %v2476_v39  ;;  %v872_v10 = vsel %vm869_vm11, %v871_v41, %v867_v5  ;;  %vm881_vm12 = vmor %vm879_vm13, %vm880_vm10  ;;  %v1263_v15 = vadd.f32 %v1262_v29, %v1261_v24  ;;  %vm894_vm2 = vweird.f32 %v2476_v39  ;;  %v1729_v41 = vld [vmem:[%s2857_s9 + $0x1] ss:$0 sm:$0xff] }
 0x21d   :  { %v876_v58 = vsub.f32 1.0, %v875_v46  ;;  %v951_v18 = vmul.f32 %v872_v10, %v2403_v17 }
 0x21e   :  { %v792_v55 = vpop.f32.mrf.mxu3  ;;  %v1265_v19 = vadd.f32 1e-06, %v1263_v15  ;;  %v2544_v15 = vld [vmem:[%s2860_s0 + $0x8] sm:$0xff] }
 0x21f   :  { %v877_v51 = vmul.f32 %v1828_v38, %v876_v58  ;;  %v2505_v1 = vadd.f32 %v2386_v37, %v792_v55 }
 0x221   :  { %v1830_v4 = vpop.eup %1829  ;;  %v878_v0 = vadd.f32 %v1828_v38, %v877_v51  ;;  %v1650_v52 = vmul.f32 -1.442695, %v2505_v1 }
 0x222   :  { %v1832_v8 = vpop.eup %1831  ;;  %v826_v12 = vadd.f32 1.0, %v1830_v4 }
 0x223   :  { %v1436_v16 = vpop.f32.mrf.mxu1  ;;  %v882_v14 = vsel %vm881_vm12, %v1828_v38, %v878_v0  ;;  %v890_v62 = vmul.f32 %v1832_v8, %v2476_v39  ;;  %1833 = vpow2.f32 %v1650_v52  ;;  %vm895_vm15 = vweird.f32 %v1832_v8 }
 0x224   :  { %1268 = vperm.xlu2 %1720, %v1264_v54   ;;  %1443 = vrot.lane.b32.xlu0 %v1436_v16, %s1905_s26  ;;  %v887_v3 = vsel %vm884_vm14, %v886_v11, %v882_v14  ;;  %1835 = vrcp.f32 %v826_v12  ;;  %vm896_vm3 = vmor %vm894_vm2, %vm895_vm15  ;;  %v915_v32 = vand.u32 2147483648, %v826_v12  ;;  %v913_v53 = vand.u32 2147483647, %v826_v12 }
 0x225   :  { %v952_v43 = vmul.f32 %v887_v3, %v2407_v45  ;;  %v891_v56 = vsub.f32 1.0, %v890_v62  ;;  %v900_v45 = vand.u32 2147483648, %v2476_v39  ;;  %vm909_vm6 = vweird.f32 %v826_v12  ;;  %v1452_v3 = vpop.permute.xlu1 %1451 }
 0x226   :  { %v794_v25 = vpop.f32.mrf.mxu3  ;;  %v916_v34 = vor.u32 1.1754944e-38, %v915_v32  ;;  %vm914_vm8 = vcmp.eq.f32.partialorder %v913_v53, 8.507059e+37 }
 0x227   :  { %v892_v7 = vmul.f32 %v1832_v8, %v891_v56  ;;  %v2514_v20 = vadd.f32 %v2386_v37, %v794_v25  ;;  %v958_v9 = vpack.c.bf16 %v952_v43, %v951_v18  ;;  %v898_v37 = vand.u32 2147483647, %v2476_v39 }
 0x228   :  { %v901_v36 = vor.u32 1.1754944e-38, %v900_v45 }
 0x229   :  { %v1834_v21 = vpop.eup %1833  ;;  %v1651_v2 = vmul.f32 -1.442695, %v2514_v20  ;;  %1661 = vmatmul.msk.bf16.gmra.mxu0 %vm55_vm1, %v958_v9  ;;  %v893_v28 = vadd.f32 %v1832_v8, %v892_v7  ;;  %vm899_vm5 = vcmp.eq.f32.partialorder %v898_v37, 8.507059e+37  ;;  %v2555_v7 = vld [vmem:[%s2857_s9] ss:$0 sm:$0xff] }
 0x22a   :  { %v1836_v27 = vpop.eup %1835  ;;  %v827_v57 = vadd.f32 1.0, %v1834_v21 }
 0x22b   :  { %v905_v17 = vmul.f32 %v1836_v27, %v826_v12  ;;  %1837 = vpow2.f32 %v1651_v2  ;;  %v897_v23 = vsel %vm896_vm3, %v1832_v8, %v893_v28  ;;  %vm910_vm4 = vweird.f32 %v1836_v27 }
 0x22c   :  { %1189 = vperm.xlu2 %1720, %v2415_v49   ;;  %1273 = vperm.xlu0 %1721, %v1265_v19   ;;  %1839 = vrcp.f32 %v827_v57  ;;  %v902_v40 = vsel %vm899_vm5, %v901_v36, %v897_v23  ;;  %vm911_vm7 = vmor %vm909_vm6, %vm910_vm4  ;;  %vm924_vm10 = vweird.f32 %v827_v57 }
 0x22d   :  { %v906_v31 = vsub.f32 1.0, %v905_v17  ;;  %v953_v50 = vmul.f32 %v902_v40, %v2437_v6 }
 0x22f   :  { %v907_v30 = vmul.f32 %v1836_v27, %v906_v31 }
 0x231   :  { %v1838_v38 = vpop.eup %1837  ;;  %v908_v42 = vadd.f32 %v1836_v27, %v907_v30 }
 0x232   :  { %v1840_v49 = vpop.eup %1839  ;;  %v828_v44 = vadd.f32 1.0, %v1838_v38 }
 0x233   :  { %v912_v46 = vsel %vm911_vm7, %v1836_v27, %v908_v42  ;;  %v920_v39 = vmul.f32 %v1840_v49, %v827_v57  ;;  %vm925_vm9 = vweird.f32 %v1840_v49 }
 0x234   :  { %1199 = vperm.xlu2 %1720, %v2420_v63   ;;  %1209 = vperm.xlu0 %1721, %v2442_v13   ;;  %v917_v48 = vsel %vm914_vm8, %v916_v34, %v912_v46  ;;  %1841 = vrcp.f32 %v828_v44  ;;  %v930_v63 = vand.u32 2147483648, %v827_v57  ;;  %v928_v13 = vand.u32 2147483647, %v827_v57  ;;  %vm926_vm11 = vmor %vm924_vm10, %vm925_vm9 }
 0x235   :  { %v954_v58 = vmul.f32 %v917_v48, %v2466_v33  ;;  %v921_v54 = vsub.f32 1.0, %v920_v39  ;;  %v945_v6 = vand.u32 2147483648, %v828_v44  ;;  %v943_v51 = vand.u32 2147483647, %v828_v44 }
 0x236   :  { %v931_v4 = vor.u32 1.1754944e-38, %v930_v63  ;;  %vm929_vm12 = vcmp.eq.f32.partialorder %v928_v13, 8.507059e+37  ;;  %vm939_vm14 = vweird.f32 %v828_v44 }
 0x237   :  { %v922_v22 = vmul.f32 %v1840_v49, %v921_v54  ;;  %v959_v60 = vpack.c.bf16 %v954_v58, %v953_v50  ;;  %v946_v52 = vor.u32 1.1754944e-38, %v945_v6  ;;  %vm944_vm2 = vcmp.eq.f32.partialorder %v943_v51, 8.507059e+37 }
 0x239   :  { %1662 = vmatmul.msk.bf16.gmra.mxu0 %vm55_vm1, %v959_v60  ;;  %v923_v55 = vadd.f32 %v1840_v49, %v922_v22 }
 0x23a   :  { %v1842_v61 = vpop.eup %1841 }
 0x23b   :  { %v935_v24 = vmul.f32 %v1842_v61, %v828_v44  ;;  %v927_v33 = vsel %vm926_vm11, %v1840_v49, %v923_v55  ;;  %vm940_vm13 = vweird.f32 %v1842_v61 }
 0x23c   :  { %1214 = vperm.xlu2 %1720, %v2471_v35   ;;  %1224 = vperm.xlu0 %1721, %v2487_v47   ;;  %v2535_v35 = vld [vmem:[%s2860_s0] sm:$0xff]  ;;  %v932_v0 = vsel %vm929_vm12, %v931_v4, %v927_v33  ;;  %vm941_vm15 = vmor %vm939_vm14, %vm940_vm13  ;;  %s1909_s0 = smov 96  }
 0x23d   :  { %v936_v29 = vsub.f32 1.0, %v935_v24  ;;  %v955_v11 = vmul.f32 %v932_v0, %v2505_v1 }
 0x23f   :  { %v937_v5 = vmul.f32 %v1842_v61, %v936_v29 }
 0x241   :  { %v938_v47 = vadd.f32 %v1842_v61, %v937_v5 }
 0x243   :  { %v942_v8 = vsel %vm941_vm15, %v1842_v61, %v938_v47 }
 0x244   :  { %1310 = vrot.lane.b32.xlu2 %v1729_v41, %s1907_s29  ;;  %1357 = vrot.lane.b32.xlu0 %v2535_v35, %s1908_s30  ;;  %v947_v10 = vsel %vm944_vm2, %v946_v52, %v942_v8 }
 0x245   :  { %v956_v12 = vmul.f32 %v947_v10, %v2514_v20 }
 0x247   :  { %v960_v16 = vpack.c.bf16 %v956_v12, %v955_v11 }
 0x249   :  { %1663 = vmatmul.msk.bf16.gmra.mxu0 %vm55_vm1, %v960_v16 }
 0x24c   :  { %1359 = vrot.lane.b32.xlu2 %v2544_v15, %s1908_s30 }
 0x276   :  { %v1442_v14 = vpop.permute.xlu2 %1441 }
 0x277   :  { %v1447_v62 = vadd.f32 %v1442_v14, %v2057_v59 }
 0x279   :  { %v2549_v18 = vadd.f32 %v1452_v3, %v1447_v62 }
 0x27b   :  { %v1683_v1 = vmul.f32 -1.442695, %v2549_v18 }
 0x27d   :  { %1843 = vpow2.f32 %v1683_v1 }
 0x283   :  { %v1844_v43 = vpop.eup %1843 }
 0x284   :  { %v1462_v56 = vadd.f32 1.0, %v1844_v43  ;;  %v2596_v43 = vpop.permute.xlu2 %1268 }
 0x286   :  { %1845 = vrcp.f32 %v1462_v56  ;;  %vm1469_vm4 = vweird.f32 %v1462_v56  ;;  %v1473_v44 = vand.u32 2147483647, %v1462_v56  ;;  %v1475_v46 = vand.u32 2147483648, %v1462_v56 }
 0x288   :  { %vm1474_vm7 = vcmp.eq.f32.partialorder %v1473_v44, 8.507059e+37  ;;  %v1476_v24 = vor.u32 1.1754944e-38, %v1475_v46 }
 0x28c   :  { %v1846_v27 = vpop.eup %1845 }
 0x28d   :  { %v1465_v17 = vmul.f32 %v1846_v27, %v1462_v56  ;;  %vm1470_vm3 = vweird.f32 %v1846_v27 }
 0x28e   :  { %vm2571_vm5 = vmor %vm1469_vm4, %vm1470_vm3 }
 0x28f   :  { %v1466_v37 = vsub.f32 1.0, %v1465_v17 }
 0x291   :  { %v1467_v23 = vmul.f32 %v1846_v27, %v1466_v37 }
 0x293   :  { %v1468_v49 = vadd.f32 %v1846_v27, %v1467_v23 }
 0x295   :  { %v1472_v54 = vsel %vm2571_vm5, %v1846_v27, %v1468_v49 }
 0x296   :  { %v1444_v25 = vpop.permute.xlu0 %1443  ;;  %v999_v9 = vpop.f32.mrf.mxu0  ;;  %v1477_v6 = vsel %vm1474_vm7, %v1476_v24, %v1472_v54 }
 0x297   :  { %v1448_v20 = vadd.f32 %v1444_v25, %v2090_v26  ;;  %v2559_v2 = vadd.f32 %v2555_v7, %v999_v9  ;;  %v1494_v4 = vmul.f32 %v1477_v6, %v2549_v18 }
 0x299   :  { %v1455_v19 = vadd.f32 %v1452_v3, %v1448_v20  ;;  %v1664_v57 = vmul.f32 -1.442695, %v2559_v2 }
 0x29b   :  { %v1684_v21 = vmul.f32 -1.442695, %v1455_v19 }
 0x29d   :  { %1847 = vpow2.f32 %v1684_v21 }
 0x29e   :  { %v1001_v28 = vpop.f32.mrf.mxu0  ;;  %1849 = vpow2.f32 %v1664_v57  ;;  %v2607_v21 = vpop.permute.xlu0 %1273 }
 0x29f   :  { %v2567_v38 = vadd.f32 %v2555_v7, %v1001_v28 }
 0x2a1   :  { %v1665_v50 = vmul.f32 -1.442695, %v2567_v38 }
 0x2a3   :  { %v1848_v45 = vpop.eup %1847 }
 0x2a4   :  { %v1463_v31 = vadd.f32 1.0, %v1848_v45  ;;  %v1850_v53 = vpop.eup %1849 }
 0x2a5   :  { %v2569_v40 = vadd.f32 1.0, %v1850_v53 }
 0x2a6   :  { %1851 = vrcp.f32 %v1463_v31  ;;  %v1004_v32 = vpop.f32.mrf.mxu0  ;;  %v1490_v22 = vand.u32 2147483648, %v1463_v31  ;;  %v1488_v61 = vand.u32 2147483647, %v1463_v31  ;;  %vm1484_vm8 = vweird.f32 %v1463_v31 }
 0x2a7   :  { %v2563_v30 = vadd.f32 %v2555_v7, %v1004_v32  ;;  %v1062_v45 = vand.u32 2147483648, %v2569_v40  ;;  %vm1056_vm13 = vweird.f32 %v2569_v40 }
 0x2a8   :  { %v1491_v33 = vor.u32 1.1754944e-38, %v1490_v22  ;;  %vm1489_vm10 = vcmp.eq.f32.partialorder %v1488_v61, 8.507059e+37 }
 0x2a9   :  { %v1666_v36 = vmul.f32 -1.442695, %v2563_v30  ;;  %v1063_v46 = vor.u32 1.1754944e-38, %v1062_v45 }
 0x2ab   :  { %1853 = vpow2.f32 %v1666_v36 }
 0x2ac   :  { %v1852_v42 = vpop.eup %1851  ;;  %1855 = vrcp.f32 %v2569_v40 }
 0x2ad   :  { %v1480_v34 = vmul.f32 %v1852_v42, %v1463_v31  ;;  %vm1485_vm6 = vweird.f32 %v1852_v42  ;;  %1857 = vpow2.f32 %v1665_v50  ;;  %v1060_v31 = vand.u32 2147483647, %v2569_v40 }
 0x2ae   :  { %v1006_v58 = vpop.f32.mrf.mxu0  ;;  %vm1486_vm9 = vmor %vm1484_vm8, %vm1485_vm6 }
 0x2af   :  { %v1481_v48 = vsub.f32 1.0, %v1480_v34  ;;  %v2580_v55 = vadd.f32 %v2555_v7, %v1006_v58  ;;  %vm1061_vm14 = vcmp.eq.f32.partialorder %v1060_v31, 8.507059e+37  ;;  %v1190_v31 = vpop.permute.xlu2 %1189 }
 0x2b1   :  { %v1482_v60 = vmul.f32 %v1852_v42, %v1481_v48  ;;  %v1667_v13 = vmul.f32 -1.442695, %v2580_v55  ;;  %v1854_v29 = vpop.eup %1853 }
 0x2b2   :  { %v1856_v51 = vpop.eup %1855  ;;  %v2584_v0 = vadd.f32 1.0, %v1854_v29 }
 0x2b3   :  { %v1483_v63 = vadd.f32 %v1852_v42, %v1482_v60  ;;  %1859 = vpow2.f32 %v1667_v13  ;;  %v1858_v8 = vpop.eup %1857  ;;  %v1052_v10 = vmul.f32 %v1856_v51, %v2569_v40  ;;  %vm1057_vm11 = vweird.f32 %v1856_v51 }
 0x2b4   :  { %1861 = vrcp.f32 %v2584_v0  ;;  %v2592_v62 = vadd.f32 1.0, %v1858_v8  ;;  %vm1058_vm12 = vmor %vm1056_vm13, %vm1057_vm11  ;;  %vm1086_vm4 = vweird.f32 %v2584_v0  ;;  %v1090_v8 = vand.u32 2147483647, %v2584_v0 }
 0x2b5   :  { %v1487_v5 = vsel %vm1486_vm9, %v1852_v42, %v1483_v63  ;;  %v1053_v3 = vsub.f32 1.0, %v1052_v10 }
 0x2b6   :  { %v1492_v41 = vsel %vm1489_vm10, %v1491_v33, %v1487_v5  ;;  %v1009_v52 = vpop.f32.mrf.mxu0  ;;  %v1075_v29 = vand.u32 2147483647, %v2592_v62  ;;  %vm1071_vm8 = vweird.f32 %v2592_v62  ;;  %vm1091_vm9 = vcmp.eq.f32.partialorder %v1090_v8, 8.507059e+37 }
 0x2b7   :  { %v1495_v47 = vmul.f32 %v1492_v41, %v1455_v19  ;;  %v2588_v11 = vadd.f32 %v2555_v7, %v1009_v52  ;;  %v1054_v20 = vmul.f32 %v1856_v51, %v1053_v3 }
 0x2b8   :  { %vm2687_vm10 = vcmp.eq.f32.partialorder %v1075_v29, 8.507059e+37 }
 0x2b9   :  { %v1496_v12 = vpack.c.bf16 %v1495_v47, %v1494_v4  ;;  %v1668_v16 = vmul.f32 -1.442695, %v2588_v11  ;;  %v1860_v14 = vpop.eup %1859  ;;  %v1055_v28 = vadd.f32 %v1856_v51, %v1054_v20  ;;  %v1092_v47 = vand.u32 2147483648, %v2584_v0 }
 0x2ba   :  { %v2594_v18 = vadd.f32 1.0, %v1860_v14  ;;  %v2602_v25 = vpop.eup %1861 }
 0x2bb   :  { %1499 = vrot.lane.b32.xlu1 %v1496_v12, %s1909_s0  ;;  %1863 = vpow2.f32 %v1668_v16  ;;  %v1082_v27 = vmul.f32 %v2602_v25, %v2584_v0  ;;  %v1059_v42 = vsel %vm1058_vm12, %v1856_v51, %v1055_v28  ;;  %vm1087_vm2 = vweird.f32 %v2602_v25 }
 0x2bc   :  { %1865 = vrcp.f32 %v2592_v62  ;;  %v1064_v58 = vsel %vm1061_vm14, %v1063_v46, %v1059_v42  ;;  %vm2664_vm5 = vmor %vm1086_vm4, %vm1087_vm2  ;;  %v1093_v28 = vor.u32 1.1754944e-38, %v1092_v47  ;;  %vm1101_vm14 = vweird.f32 %v2594_v18 }
 0x2bd   :  { %1867 = vrcp.f32 %v2596_v43  ;;  %v1083_v23 = vsub.f32 1.0, %v1082_v27  ;;  %v1171_v13 = vmul.f32 %v1064_v58, %v2559_v2  ;;  %vm1281_vm4 = vweird.f32 %v2596_v43 }
 0x2be   :  { %v1011_v1 = vpop.f32.mrf.mxu0  ;;  %1869 = vrcp.f32 %v2594_v18 }
 0x2bf   :  { %v2600_v56 = vadd.f32 %v2555_v7, %v1011_v1  ;;  %v1084_v54 = vmul.f32 %v2602_v25, %v1083_v23  ;;  %v1077_v23 = vand.u32 2147483648, %v2592_v62 }
 0x2c1   :  { %v1669_v9 = vmul.f32 -1.442695, %v2600_v56  ;;  %v1864_v19 = vpop.eup %1863  ;;  %v1085_v5 = vadd.f32 %v2602_v25, %v1084_v54  ;;  %v1107_v54 = vand.u32 2147483648, %v2594_v18 }
 0x2c2   :  { %v2611_v57 = vadd.f32 1.0, %v1864_v19  ;;  %v2614_v17 = vpop.eup %1865 }
 0x2c3   :  { %1871 = vpow2.f32 %v1669_v9  ;;  %v2618_v37 = vpop.eup %1867  ;;  %v1067_v49 = vmul.f32 %v2614_v17, %v2592_v62  ;;  %vm1072_vm15 = vweird.f32 %v2614_v17  ;;  %v1089_v0 = vsel %vm2664_vm5, %v2602_v25, %v1085_v5 }
 0x2c4   :  { %1873 = vrcp.f32 %v2607_v21  ;;  %v2625_v36 = vpop.eup %1869  ;;  %v2631_v44 = vmul.f32 %v2618_v37, %v2596_v43  ;;  %v1122_v10 = vand.u32 2147483648, %v2611_v57  ;;  %vm1116_vm6 = vweird.f32 %v2611_v57  ;;  %vm2694_vm13 = vmor %vm1071_vm8, %vm1072_vm15 }
 0x2c5   :  { %1875 = vrcp.f32 %v2611_v57  ;;  %v1097_v22 = vmul.f32 %v2625_v36, %v2594_v18  ;;  %v1068_v60 = vsub.f32 1.0, %v1067_v49  ;;  %v1120_v3 = vand.u32 2147483647, %v2611_v57 }
 0x2c6   :  { %v1014_v32 = vpop.f32.mrf.mxu0  ;;  %v1278_v24 = vsub.f32 1.0, %v2631_v44  ;;  %v1123_v25 = vor.u32 1.1754944e-38, %v1122_v10  ;;  %v1094_v42 = vsel %vm1091_vm9, %v1093_v28, %v1089_v0  ;;  %vm1102_vm12 = vweird.f32 %v2625_v36  ;;  %v1897_v0 = vld [vmem:[%s2853_s3 + $0x20] sm:$0xff] }
 0x2c7   :  { %v2623_v53 = vadd.f32 %v2555_v7, %v1014_v32  ;;  %v1098_v51 = vsub.f32 1.0, %v1097_v22  ;;  %v1069_v4 = vmul.f32 %v2614_v17, %v1068_v60  ;;  %vm1121_vm11 = vcmp.eq.f32.partialorder %v1120_v3, 8.507059e+37  ;;  %v2709_v22 = vpop.permute.xlu1 %1194  ;;  %v1705_v60 = vld [vmem:[%s2852_s6 + $0x48] sm:$0xff]  ;;  %vm2720_vm2 = vmor %vm1101_vm14, %vm1102_vm12 }
 0x2c8   :  { %v1173_v29 = vmul.f32 %v1094_v42, %v2563_v30  ;;  %1522 = vmatpush.bf16.msrb.mxu2 %v1705_v60  ;;  %v1704_v30 = vld [vmem:[%s2852_s6 + $0x40] sm:$0xff]  ;;  %v1108_v10 = vor.u32 1.1754944e-38, %v1107_v54  ;;  %v1210_v42 = vpop.permute.xlu0 %1209  ;;  %v1285_v5 = vand.u32 2147483647, %v2596_v43 }
 0x2c9   :  { %v1872_v34 = vpop.eup %1871  ;;  %v1670_v40 = vmul.f32 -1.442695, %v2623_v53  ;;  %v1099_v20 = vmul.f32 %v2625_v36, %v1098_v51  ;;  %v1070_v27 = vadd.f32 %v2614_v17, %v1069_v4 }
 0x2ca   :  { %v2634_v39 = vpop.eup %1873  ;;  %v2636_v48 = vadd.f32 1.0, %v1872_v34 }
 0x2cb   :  { %v1876_v50 = vpop.eup %1875  ;;  %1877 = vpow2.f32 %v1670_v40  ;;  %v2646_v63 = vmul.f32 %v2634_v39, %v2607_v21  ;;  %v1100_v34 = vadd.f32 %v2625_v36, %v1099_v20  ;;  %v1074_v58 = vsel %vm2694_vm13, %v2614_v17, %v1070_v27 }
 0x2cc   :  { %v1112_v61 = vmul.f32 %v1876_v50, %v2611_v57  ;;  %1879 = vrcp.f32 %v2636_v48  ;;  %vm1117_vm3 = vweird.f32 %v1876_v50  ;;  %v1137_v4 = vand.u32 2147483648, %v2636_v48  ;;  %1523 = vmatpush.bf16.msrb.mxu2 %v1704_v30  ;;  %v1901_v30 = vld [vmem:[%s2853_s3 + $0x30] sm:$0xff] }
 0x2cd   :  { %vm2676_vm7 = vmor %vm1116_vm6, %vm1117_vm3  ;;  %vm1131_vm3 = vweird.f32 %v2636_v48  ;;  %vm1282_vm13 = vweird.f32 %v2618_v37 }
 0x2ce   :  { %v1113_v6 = vsub.f32 1.0, %v1112_v61  ;;  %v1016_v33 = vpop.f32.mrf.mxu0  ;;  %v1138_v9 = vor.u32 1.1754944e-38, %v1137_v4  ;;  %vm2794_vm14 = vmor %vm1281_vm4, %vm1282_vm13 }
 0x2cf   :  { %v2654_v41 = vadd.f32 %v2555_v7, %v1016_v33  ;;  %v1078_v33 = vor.u32 1.1754944e-38, %v1077_v23  ;;  %v1205_v32 = vpop.permute.xlu1 %1204 }
 0x2d0   :  { %v1114_v52 = vmul.f32 %v1876_v50, %v1113_v6  ;;  %v1105_v6 = vand.u32 2147483647, %v2594_v18  ;;  %v1104_v18 = vsel %vm2720_vm2, %v2625_v36, %v1100_v34  ;;  %v1896_v36 = vld [vmem:[%s2853_s3 + $0x10] sm:$0xff] }
 0x2d1   :  { %v1878_v2 = vpop.eup %1877  ;;  %v1671_v12 = vmul.f32 -1.442695, %v2654_v41  ;;  %v1079_v8 = vsel %vm2687_vm10, %v1078_v33, %v1074_v58 }
 0x2d2   :  { %v2662_v16 = vpop.eup %1879  ;;  %v1115_v14 = vadd.f32 %v1876_v50, %v1114_v52  ;;  %v2670_v1 = vadd.f32 1.0, %v1878_v2  ;;  %v1135_v52 = vand.u32 2147483647, %v2636_v48  ;;  %vm1106_vm6 = vcmp.eq.f32.partialorder %v1105_v6, 8.507059e+37 }
 0x2d3   :  { %v1127_v19 = vmul.f32 %v2662_v16, %v2636_v48  ;;  %1881 = vpow2.f32 %v1671_v12  ;;  %vm1132_vm15 = vweird.f32 %v2662_v16  ;;  %v1181_v48 = vmul.f32 %v1896_v36, %v1173_v29 }
 0x2d4   :  { %v1119_v57 = vsel %vm2676_vm7, %v1876_v50, %v1115_v14  ;;  %1883 = vrcp.f32 %v2670_v1  ;;  %v1895_v50 = vld [vmem:[%s2853_s3] sm:$0xff]  ;;  %vm2742_vm5 = vmor %vm1131_vm3, %vm1132_vm15  ;;  %v1109_v3 = vsel %vm1106_vm6, %v1108_v10, %v1104_v18  ;;  %vm1136_vm7 = vcmp.eq.f32.partialorder %v1135_v52, 8.507059e+37 }
 0x2d5   :  { %v1128_v45 = vsub.f32 1.0, %v1127_v19  ;;  %v1124_v46 = vsel %vm1121_vm11, %v1123_v25, %v1119_v57  ;;  %v1179_v62 = vmul.f32 %v1895_v50, %v1171_v13  ;;  %v1152_v19 = vand.u32 2147483648, %v2670_v1  ;;  %v1200_v25 = vpop.permute.xlu2 %1199 }
 0x2d6   :  { %v1175_v51 = vmul.f32 %v1124_v46, %v2588_v11  ;;  %v1150_v28 = vand.u32 2147483647, %v2670_v1  ;;  %v1287_v57 = vand.u32 2147483648, %v2596_v43  ;;  %v1229_v23 = vmul.f32 %v1200_v25, %v1181_v48 }
 0x2d7   :  { %v1129_v40 = vmul.f32 %v2662_v16, %v1128_v45  ;;  %v1227_v11 = vmul.f32 %v1190_v31, %v1179_v62  ;;  %v1172_v45 = vmul.f32 %v1079_v8, %v2567_v38  ;;  %v1174_v49 = vmul.f32 %v1109_v3, %v2580_v55  ;;  %v1898_v55 = vld [vmem:[%s2853_s3 + $0x8] sm:$0xff]  ;;  %v1220_v10 = vpop.permute.xlu1 %1219 }
 0x2d8   :  { %v1183_v20 = vmul.f32 %v1897_v0, %v1175_v51  ;;  %vm1146_vm9 = vweird.f32 %v2670_v1  ;;  %vm1151_vm11 = vcmp.eq.f32.partialorder %v1150_v28, 8.507059e+37  ;;  %v1236_v6 = vsel %vm133_vm0, %v1229_v23, 0.0 }
 0x2d9   :  { %v1882_v61 = vpop.eup %1881  ;;  %v1130_v13 = vadd.f32 %v2662_v16, %v1129_v40  ;;  %v1293_v40 = vsub.f32 1.0, %v2646_v63  ;;  %v1235_v50 = vsel %vm133_vm0, %v1227_v11, 0.0  ;;  %vm1286_vm3 = vcmp.eq.f32.partialorder %v1285_v5, 8.507059e+37 }
 0x2da   :  { %v1884_v17 = vpop.eup %1883  ;;  %v2726_v47 = vadd.f32 1.0, %v1882_v61  ;;  %v1231_v44 = vmul.f32 %v1210_v42, %v1183_v20  ;;  %v1237_v12 = vadd.f32 %v1236_v6, %v1235_v50  ;;  %vm1297_vm6 = vweird.f32 %v2634_v39 }
 0x2db   :  { %v1142_v2 = vmul.f32 %v1884_v17, %v2670_v1  ;;  %v1134_v7 = vsel %vm2742_vm5, %v2662_v16, %v1130_v13  ;;  %vm1147_vm8 = vweird.f32 %v1884_v17  ;;  %v1279_v16 = vmul.f32 %v2618_v37, %v1278_v24 }
 0x2dc   :  { %1885 = vrcp.f32 %v2726_v47  ;;  %v1139_v31 = vsel %vm1136_vm7, %v1138_v9, %v1134_v7  ;;  %vm1148_vm10 = vmor %vm1146_vm9, %vm1147_vm8  ;;  %v1153_v24 = vor.u32 1.1754944e-38, %v1152_v19  ;;  %v1180_v1 = vmul.f32 %v1898_v55, %v1172_v45 }
 0x2dd   :  { %v1143_v14 = vsub.f32 1.0, %v1142_v2  ;;  %v1176_v38 = vmul.f32 %v1139_v31, %v2600_v56  ;;  %v1280_v63 = vadd.f32 %v2618_v37, %v1279_v16  ;;  %v1899_v56 = vld [vmem:[%s2853_s3 + $0x18] sm:$0xff]  ;;  %v1165_v13 = vand.u32 2147483647, %v2726_v47 }
 0x2de   :  { %v1182_v29 = vmul.f32 %v1899_v56, %v1174_v49  ;;  %v1238_v33 = vsel %vm133_vm0, %v1231_v44, 0.0  ;;  %v1288_v2 = vor.u32 1.1754944e-38, %v1287_v57  ;;  %v1294_v11 = vmul.f32 %v2634_v39, %v1293_v40 }
 0x2df   :  { %v1144_v27 = vmul.f32 %v1884_v17, %v1143_v14  ;;  %v1228_v8 = vmul.f32 %v2709_v22, %v1180_v1  ;;  %vm1161_vm15 = vweird.f32 %v2726_v47  ;;  %v1215_v14 = vpop.permute.xlu2 %1214  ;;  %v1239_v43 = vadd.f32 %v1238_v33, %v1237_v12 }
 0x2e0   :  { %v1230_v48 = vmul.f32 %v1205_v32, %v1182_v29  ;;  %v1284_v0 = vsel %vm2794_vm14, %v2618_v37, %v1280_v63  ;;  %vm1166_vm4 = vcmp.eq.f32.partialorder %v1165_v13, 8.507059e+37  ;;  %vm1296_vm5 = vweird.f32 %v2607_v21  ;;  %v1902_v32 = vld [vmem:[%s2853_s3 + $0x38] sm:$0xff] }
 0x2e1   :  { %v1145_v34 = vadd.f32 %v1884_v17, %v1144_v27  ;;  %v1302_v27 = vand.u32 2147483648, %v2607_v21  ;;  %v1289_v57 = vsel %vm1286_vm3, %v1288_v2, %v1284_v0  ;;  %v1295_v25 = vadd.f32 %v2634_v39, %v1294_v11  ;;  %vm1298_vm7 = vmor %vm1296_vm5, %vm1297_vm6 }
 0x2e2   :  { %v1886_v46 = vpop.eup %1885  ;;  %v1243_v16 = vsel %vm133_vm0, %v1230_v48, 0.0  ;;  %v1300_v45 = vand.u32 2147483647, %v2607_v21  ;;  %v1242_v31 = vsel %vm133_vm0, %v1228_v8, 0.0  ;;  %vm1554_vm3 = vcmask 277504  }
 0x2e3   :  { %v1149_v62 = vsel %vm1148_vm10, %v1884_v17, %v1145_v34  ;;  %v1157_v58 = vmul.f32 %v1886_v46, %v2726_v47  ;;  %v1167_v17 = vand.u32 2147483648, %v2726_v47  ;;  %vm1162_vm12 = vweird.f32 %v1886_v46 }
 0x2e4   :  { %v1154_v54 = vsel %vm1151_vm11, %v1153_v24, %v1149_v62  ;;  %vm1163_vm2 = vmor %vm1161_vm15, %vm1162_vm12  ;;  %v1244_v49 = vadd.f32 %v1243_v16, %v1242_v31  ;;  %v1303_v34 = vor.u32 1.1754944e-38, %v1302_v27  ;;  %v1299_v44 = vsel %vm1298_vm7, %v2634_v39, %v1295_v25 }
 0x2e5   :  { %v1177_v60 = vmul.f32 %v1154_v54, %v2623_v53  ;;  %v1158_v61 = vsub.f32 1.0, %v1157_v58  ;;  %v1900_v53 = vld [vmem:[%s2853_s3 + $0x28] sm:$0xff]  ;;  %v1168_v3 = vor.u32 1.1754944e-38, %v1167_v17  ;;  %vm1301_vm8 = vcmp.eq.f32.partialorder %v1300_v45, 8.507059e+37  ;;  %s1910_s3 = smov 66  }
 0x2e6   :  { %v1184_v51 = vmul.f32 %v1900_v53, %v1176_v38  ;;  %v1304_v38 = vsel %vm1301_vm8, %v1303_v34, %v1299_v44  ;;  %v1903_v34 = vld [vmem:[%s2854_s1 + $0x8] sm:$0xff] }
 0x2e7   :  { %v1159_v4 = vmul.f32 %v1886_v46, %v1158_v61  ;;  %v1185_v18 = vmul.f32 %v1901_v30, %v1177_v60  ;;  %v1311_v58 = vpop.permute.xlu2 %1310 }
 0x2e8   :  { %v1232_v20 = vmul.f32 %v1215_v14, %v1184_v51  ;;  %v1313_v21 = vadd.f32 %v1311_v58, %v2057_v59  ;;  %v1314_v54 = vadd.f32 %v1311_v58, %v2090_v26 }
 0x2e9   :  { %v1160_v36 = vadd.f32 %v1886_v46, %v1159_v4  ;;  %v1233_v7 = vmul.f32 %v1220_v10, %v1185_v18 }
 0x2ea   :  { %v1245_v42 = vsel %vm133_vm0, %v1232_v20, 0.0  ;;  %v1672_v1 = vmul.f32 -1.442695, %v1313_v21  ;;  %v1673_v63 = vmul.f32 -1.442695, %v1314_v54 }
 0x2eb   :  { %v1164_v9 = vsel %vm1163_vm2, %v1886_v46, %v1160_v36  ;;  %v1240_v22 = vsel %vm133_vm0, %v1233_v7, 0.0  ;;  %v1246_v40 = vadd.f32 %v1245_v42, %v1244_v49  ;;  %vm1557_vm2 = vcmask 293888  }
 0x2ec   :  { %v1169_v19 = vsel %vm1166_vm4, %v1168_v3, %v1164_v9  ;;  %v1241_v47 = vadd.f32 %v1240_v22, %v1239_v43  ;;  %1887 = vpow2.f32 %v1672_v1  ;;  %vm1560_vm4 = vcmask 310272  }
 0x2ed   :  { %v1178_v28 = vmul.f32 %v1169_v19, %v2654_v41  ;;  %v1225_v41 = vpop.permute.xlu0 %1224  ;;  %1889 = vpow2.f32 %v1673_v63 }
 0x2ee   :  { %v1290_v37 = vmul.f32 %v1289_v57, %v1241_v47 }
 0x2ef   :  { %v1186_v23 = vmul.f32 %v1902_v32, %v1178_v28  ;;  %v1360_v20 = vpop.permute.xlu2 %1359 }
 0x2f0   :  { %1367 = vrot.lane.b32.xlu1 %v1290_v37, %s1907_s29 }
 0x2f1   :  { %v1234_v46 = vmul.f32 %v1225_v41, %v1186_v23  ;;  %v1730_v41 = vld [vmem:[%s2856_s8 + $0x5] ss:$0 sm:$0xff] }
 0x2f2   :  { %v1888_v39 = vpop.eup %1887 }
 0x2f3   :  { %v1247_v24 = vsel %vm133_vm0, %v1234_v46, 0.0  ;;  %v1321_v60 = vadd.f32 1.0, %v1888_v39  ;;  %v1890_v61 = vpop.eup %1889 }
 0x2f4   :  { %v1248_v50 = vadd.f32 %v1247_v24, %v1246_v40  ;;  %v1322_v56 = vadd.f32 1.0, %v1890_v61 }
 0x2f5   :  { %1891 = vrcp.f32 %v1321_v60  ;;  %v1334_v51 = vand.u32 2147483648, %v1321_v60  ;;  %vm1328_vm9 = vweird.f32 %v1321_v60  ;;  %v1332_v26 = vand.u32 2147483647, %v1321_v60  ;;  %v1358_v12 = vpop.permute.xlu0 %1357 }
 0x2f6   :  { %v1305_v62 = vmul.f32 %v1304_v38, %v1248_v50  ;;  %1893 = vrcp.f32 %v1322_v56  ;;  %v1349_v11 = vand.u32 2147483648, %v1322_v56  ;;  %vm1343_vm12 = vweird.f32 %v1322_v56  ;;  %v1904_v38 = vld [vmem:[%s2854_s1] sm:$0xff] }
 0x2f7   :  { %v1335_v18 = vor.u32 1.1754944e-38, %v1334_v51  ;;  %vm1333_vm11 = vcmp.eq.f32.partialorder %v1332_v26, 8.507059e+37  ;;  %v1347_v8 = vand.u32 2147483647, %v1322_v56 }
 0x2f8   :  { %1369 = vrot.lane.b32.xlu0 %v1305_v62, %s1907_s29  ;;  %v1350_v48 = vor.u32 1.1754944e-38, %v1349_v11  ;;  %s1911_s29 = smov 126  }
 0x2f9   :  { %vm1348_vm15 = vcmp.eq.f32.partialorder %v1347_v8, 8.507059e+37 }
 0x2fb   :  { %v1892_v29 = vpop.eup %1891 }
 0x2fc   :  { %v1324_v6 = vmul.f32 %v1892_v29, %v1321_v60  ;;  %v1894_v17 = vpop.eup %1893  ;;  %vm1329_vm0 = vweird.f32 %v1892_v29 }
 0x2fd   :  { %v1339_v59 = vmul.f32 %v1894_v17, %v1322_v56  ;;  %vm1330_vm10 = vmor %vm1328_vm9, %vm1329_vm0  ;;  %vm1344_vm13 = vweird.f32 %v1894_v17 }
 0x2fe   :  { %v1325_v13 = vsub.f32 1.0, %v1324_v6  ;;  %vm1345_vm14 = vmor %vm1343_vm12, %vm1344_vm13 }
 0x2ff   :  { %v1340_v5 = vsub.f32 1.0, %v1339_v59 }
 0x300   :  { %v1326_v33 = vmul.f32 %v1892_v29, %v1325_v13 }
 0x301   :  { %v1341_v4 = vmul.f32 %v1894_v17, %v1340_v5 }
 0x302   :  { %v1327_v53 = vadd.f32 %v1892_v29, %v1326_v33 }
 0x303   :  { %v1342_v2 = vadd.f32 %v1894_v17, %v1341_v4 }
 0x304   :  { %v1331_v30 = vsel %vm1330_vm10, %v1892_v29, %v1327_v53 }
 0x305   :  { %v1336_v52 = vsel %vm1333_vm11, %v1335_v18, %v1331_v30  ;;  %v1346_v36 = vsel %vm1345_vm14, %v1894_v17, %v1342_v2 }
 0x306   :  { %v1353_v10 = vmul.f32 %v1336_v52, %v1313_v21  ;;  %v1351_v14 = vsel %vm1348_vm15, %v1350_v48, %v1346_v36 }
 0x307   :  { %v1354_v0 = vmul.f32 %v1351_v14, %v1314_v54 }
 0x308   :  { %v1363_v7 = vmul.f32 %v1358_v12, %v1353_v10 }
 0x309   :  { %v1364_v9 = vmul.f32 %v1360_v20, %v1354_v0 }
 0x32d   :  { %v1500_v55 = vpop.permute.xlu1 %1499 }
 0x32e   :  { %1693 = vmatmul.msk.bf16.vlgmr.msrb.gmra.mxu2 %vm55_vm1, %v1500_v55 }
 0x362   :  { %v1368_v3 = vpop.permute.xlu1 %1367 }
 0x363   :  { %v1373_v43 = vadd.f32 %v1368_v3, %v1363_v7 }
 0x365   :  { %1377 = vrot.lane.b32.xlu2 %v1373_v43, %s1910_s3 }
 0x36a   :  { %v1370_v22 = vpop.permute.xlu0 %1369 }
 0x36b   :  { %v1374_v19 = vadd.f32 %v1370_v22, %v1364_v9 }
 0x36d   :  { %1379 = vrot.lane.b32.xlu1 %v1374_v19, %s1910_s3 }
 0x3b1   :  { %v1525_v31 = vpop.f32.mrf.mxu2 }
 0x3b9   :  { %v1527_v32 = vpop.f32.mrf.mxu2 }
 0x3ba   :  { %v1528_v49 = vadd.f32 %v1730_v41, %v1527_v32 }
 0x3bf   :  { %v1378_v47 = vpop.permute.xlu2 %1377 }
 0x3c0   :  { %v1383_v27 = vadd.f32 %v1378_v47, %v2535_v35 }
 0x3c2   :  { %1387 = vrot.lane.b32.xlu0 %v1383_v27, %s1911_s29 }
 0x3df   :  { %v1380_v28 = vpop.permute.xlu1 %1379 }
 0x3e0   :  { %v1384_v16 = vadd.f32 %v1380_v28, %v2544_v15 }
 0x3e2   :  { %1389 = vrot.lane.b32.xlu2 %v1384_v16, %s1911_s29 }
 0x3ea   :  { %1540 = vrot.lane.b32.xlu2 %v1383_v27, %s1905_s26 }
 0x3f2   :  { %1548 = vrot.lane.b32.xlu2 %v1374_v19, %s1912_s5 }
 0x434   :  { %v1388_v57 = vpop.permute.xlu0 %1387 }
 0x435   :  { %v1393_v37 = vadd.f32 %v1388_v57, %v2535_v35  ;;  %v1526_v35 = vadd.f32 %v1730_v41, %v1525_v31 }
 0x437   :  { %1534 = vrot.lane.b32.xlu1 %v1393_v37, %s1905_s26  ;;  %v1530_v62 = vadd.f32 %v1904_v38, %v1526_v35 }
 0x43c   :  { %v1390_v25 = vpop.permute.xlu2 %1389 }
 0x43d   :  { %v1394_v45 = vadd.f32 %v1390_v25, %v2544_v15  ;;  %v1531_v15 = vadd.f32 %v1903_v34, %v1528_v49 }
 0x43f   :  { %1536 = vrot.lane.b32.xlu0 %v1394_v45, %s1905_s26  ;;  %1542 = vrot.lane.b32.xlu1 %v1384_v16, %s1905_s26 }
 0x444   :  { %v1541_v23 = vpop.permute.xlu2 %1540 }
 0x447   :  { %1546 = vrot.lane.b32.xlu0 %v1373_v43, %s1912_s5 }
 0x44c   :  { %v1549_v24 = vpop.permute.xlu2 %1548 }
 0x4a9   :  { %v1535_v42 = vpop.permute.xlu1 %1534 }
 0x4aa   :  { %v1552_v21 = vsel %vm55_vm1, %v1530_v62, %v1535_v42 }
 0x4ab   :  { %v1555_v55 = vsel %vm1554_vm3, %v1552_v21, %v1541_v23 }
 0x4b1   :  { %v1543_v46 = vpop.permute.xlu1 %1542  ;;  %v1537_v40 = vpop.permute.xlu0 %1536 }
 0x4b2   :  { %v1553_v44 = vsel %vm55_vm1, %v1531_v15, %v1537_v40 }
 0x4b3   :  { %v1556_v50 = vsel %vm1554_vm3, %v1553_v44, %v1543_v46 }
 0x4b4   :  { %v1559_v58 = vsel %vm1557_vm2, %v1556_v50, %v1549_v24 }
 0x4b5   :  { %1562 = vst.msk [vmem:[%s2861_s10 + $0x8] sm:$0xff] %vm1560_vm4, %v1559_v58 }
 0x4b9   :  { %v1547_v1 = vpop.permute.xlu0 %1546 }
 0x4ba   :  { %v1558_v54 = vsel %vm1557_vm2, %v1555_v55, %v1547_v1 }
 0x4bb   :  { %1561 = vst.msk [vmem:[%s2861_s10] sm:$0xff] %vm1560_vm4, %v1558_v54 }

</bundles_post_ra>
